<compile_context>
chip_gen: v7x
topology: tpu7x:2x2x1
jax: 0.10.0
libtpu: 0.0.40
codegen_flags: <defaults>
</compile_context>

<pallas_src>
import jax
import jax.numpy as jnp
from jax.experimental import pallas as pl
from jax.experimental.pallas import tpu as pltpu

KERNEL = 4
STRIDE = 2
PAD = 1
LRELU_SLOPE = 0.2
BN_EPS = 1e-5

_VMEM_LIMIT_CACHE = None


def _vmem_limit_bytes():
    """Generation-aware scoped-VMEM cap (128 MiB parts get ~96-112 MiB, 64 MiB
    parts stay <= 48 MiB)."""
    global _VMEM_LIMIT_CACHE
    if _VMEM_LIMIT_CACHE is None:
        try:
            cap = int(pltpu.get_tpu_info().vmem_capacity_bytes)
        except Exception:  # query unavailable -> conservative fallback
            cap = 64 * 1024 * 1024
        _VMEM_LIMIT_CACHE = int(min(cap * 3 // 4, 112 * 1024 * 1024))
    return _VMEM_LIMIT_CACHE


# ----------------------------------------------------------------------------
# Shared conv body: stride-2 4x4 conv as three slab matmuls over super-rows
# ----------------------------------------------------------------------------
def _conv_rows(a_ref, w_ref, s_rows):
    """a_ref: (M, L) bf16, M = N*Ho (one row per output row), L = 2*W_in*C_in.
    w_ref: (3, L, Kout) bf16 slab weights for super-row offsets (-1, 0, +1).
    Returns f32 (M, Kout) conv output, Kout = Wo*C_out (lane-dense)."""
    kout = w_ref.shape[2]
    a = a_ref[...]
    d_m1 = jnp.dot(a, w_ref[0], preferred_element_type=jnp.float32)
    d_0 = jnp.dot(a, w_ref[1], preferred_element_type=jnp.float32)
    d_p1 = jnp.dot(a, w_ref[2], preferred_element_type=jnp.float32)

    # Slab -1 of output row t is produced by super-row t-1 (shift results down
    # one row); slab +1 by super-row t+1 (shift up).  Rows that would read the
    # top/bottom zero padding (or cross an image boundary in the flattened
    # N*Ho index) are masked to zero.
    zrow = jnp.zeros((1, kout), jnp.float32)
    dn = jnp.concatenate([zrow, d_m1[:-1, :]], axis=0)
    up = jnp.concatenate([d_p1[1:, :], zrow], axis=0)
    row = jax.lax.broadcasted_iota(jnp.int32, d_0.shape, 0)
    oh = row % s_rows
    acc = d_0
    acc = acc + jnp.where(oh == 0, 0.0, dn)
    acc = acc + jnp.where(oh == s_rows - 1, 0.0, up)
    return acc


# ----------------------------------------------------------------------------
# Pallas kernels
# ----------------------------------------------------------------------------
def _make_conv_bn_lrelu_kernel(s_rows):
    """Fused conv + training-mode BatchNorm (affine) + LeakyReLU(0.2)."""

    def kernel(a_ref, w_ref, sel_ref, selt_ref, gamma_ref, beta_ref, o_ref):
        acc = _conv_rows(a_ref, w_ref, s_rows)               # (M, Kout) f32
        m, kout = acc.shape
        c = sel_ref.shape[1]                                 # C_out
        inv_cnt = 1.0 / (m * (kout // c))                    # 1 / (N*Ho*Wo)

        sel = sel_ref[...]                                   # (Kout, C) 0/1
        selt = selt_ref[...]                                 # (C, Kout) 0/1
        # Per-channel batch stats: reduce the M rows on the XLU, then fold the
        # Wo lane groups with a tiny selector matmul (no big relayouts).
        mean_c = jnp.dot(jnp.sum(acc, axis=0, keepdims=True), sel) * inv_cnt
        cen = acc - jnp.dot(mean_c, selt)                    # centered (2-pass var)
        var_c = jnp.dot(jnp.sum(cen * cen, axis=0, keepdims=True), sel) * inv_cnt
        scale_c = gamma_ref[...] * jax.lax.rsqrt(var_c + BN_EPS)   # (1, C)

        y = cen * jnp.dot(scale_c, selt) + jnp.dot(beta_ref[...], selt)
        y = jnp.where(y > 0, y, LRELU_SLOPE * y)             # f32 epilogue
        o_ref[...] = y.astype(o_ref.dtype)

    return kernel


def _make_conv_sigmoid_kernel(s_rows):
    """Final conv (C_out = 1) + bias + sigmoid."""

    def kernel(a_ref, w_ref, bias_ref, o_ref):
        z = _conv_rows(a_ref, w_ref, s_rows) + bias_ref[...]
        o_ref[...] = 1.0 / (1.0 + jnp.exp(-z))

    return kernel


# ----------------------------------------------------------------------------
# pallas_call wrappers (single invocation: whole layer fits VMEM at these sizes)
# ----------------------------------------------------------------------------
def _call_bn_layer(a2d, w_slab, sel, selt, gamma, beta, s_rows):
    m = a2d.shape[0]
    kout = w_slab.shape[2]
    return pl.pallas_call(
        _make_conv_bn_lrelu_kernel(s_rows),
        out_shape=jax.ShapeDtypeStruct((m, kout), jnp.bfloat16),
        in_specs=[pl.BlockSpec(memory_space=pltpu.VMEM)] * 6,
        out_specs=pl.BlockSpec(memory_space=pltpu.VMEM),
        compiler_params=pltpu.CompilerParams(vmem_limit_bytes=_vmem_limit_bytes()),
    )(a2d, w_slab, sel, selt, gamma, beta)


def _call_out_layer(a2d, w_slab, bias_wc, s_rows):
    m = a2d.shape[0]
    kout = w_slab.shape[2]
    return pl.pallas_call(
        _make_conv_sigmoid_kernel(s_rows),
        out_shape=jax.ShapeDtypeStruct((m, kout), jnp.float32),
        in_specs=[pl.BlockSpec(memory_space=pltpu.VMEM)] * 3,
        out_specs=pl.BlockSpec(memory_space=pltpu.VMEM),
        compiler_params=pltpu.CompilerParams(vmem_limit_bytes=_vmem_limit_bytes()),
    )(a2d, w_slab, bias_wc)


# ----------------------------------------------------------------------------
# Weight packing (wrapper-side, cheap: weights only)
# ----------------------------------------------------------------------------
def _build_slab_weights(w, width):
    """PyTorch OIHW (C_out, C_in, 4, 4) -> (3, 2*W*C_in, Wo*C_out) slab matrices.

    Super-row t holds unpadded input rows (2t, 2t+1); output row oh reads rows
    2oh-1..2oh+2, so: slab -1 uses (p=1, kh=0), slab 0 uses (p=0,kh=1)/(p=1,kh=2),
    slab +1 uses (p=0, kh=3).  The kw contraction, output-column scatter and the
    left/right zero padding are folded into the (block-banded) matrices, so the
    kernel needs no im2col, no shifted tap copies and no physical pad.
    """
    c_out, c_in = w.shape[0], w.shape[1]
    wo = width // STRIDE
    ow = jnp.arange(wo)[:, None]
    wi = jnp.arange(width)[None, :]
    # place[k, ow, wi] == 1 iff unpadded column wi feeds output column ow via
    # kernel tap kw=k (wi == 2*ow + k - 1; out-of-range == zero padding).
    place = jnp.stack([(wi == STRIDE * ow + k - PAD) for k in range(KERNEL)],
                      axis=0).astype(jnp.float32)              # (4, Wo, W)

    def half(kh):
        m = jnp.einsum("kow,cik->wioc", place, w[:, :, kh, :])  # (W, Cin, Wo, Cout)
        return m.reshape(width * c_in, wo * c_out)

    zeros = jnp.zeros((width * c_in, wo * c_out), w.dtype)
    w_m1 = jnp.concatenate([zeros, half(0)], axis=0)
    w_0 = jnp.concatenate([half(1), half(2)], axis=0)
    w_p1 = jnp.concatenate([half(3), zeros], axis=0)
    return jnp.stack([w_m1, w_0, w_p1], axis=0)                # (3, L, Kout)


# ----------------------------------------------------------------------------
# Discriminator forward
# ----------------------------------------------------------------------------
@jax.jit
def discriminator_forward(x, y, conv_weights, conv_biases, bn_gammas, bn_betas,
                          out_weight, out_bias):
    # BN-layer conv biases are mathematically cancelled by the BatchNorm mean
    # subtraction: dead work, never passed to the kernels.
    del conv_biases

    h = jnp.concatenate([x, y], axis=1)                  # torch.cat([x, y], 1)
    h = h.transpose(0, 2, 3, 1)                          # NCHW -> NHWC once
    n, hh, ww, cc = h.shape
    assert hh % 2 == 0 and ww % 2 == 0, "stride-2 conv expects even spatial dims"
    # Super-row packing: (N, H, W, C) -> (N*(H/2), 2*W*C).  Contiguous reshape:
    # no pad, no space-to-depth, no extra HBM traffic.
    a2d = h.reshape(n * (hh // 2), 2 * ww * cc).astype(jnp.bfloat16)

    for w, g, b in zip(conv_weights, bn_gammas, bn_betas):
        c_out = w.shape[0]
        ho, wo = hh // 2, ww // 2
        w_slab = _build_slab_weights(w, ww).astype(jnp.bfloat16)
        sel = jnp.tile(jnp.eye(c_out, dtype=jnp.float32), (wo, 1))    # (Wo*C, C)
        out2d = _call_bn_layer(a2d, w_slab, sel, sel.T,
                               g.reshape(1, -1).astype(jnp.float32),
                               b.reshape(1, -1).astype(jnp.float32),
                               s_rows=ho)                             # (N*Ho, Wo*C)
        hh, ww, cc = ho, wo, c_out
        assert hh % 2 == 0, "each layer halves H; need even spatial dims throughout"
        # Producer output IS the next layer's super-row packing: free reshape.
        a2d = out2d.reshape(n * (hh // 2), 2 * ww * cc)

    ho, wo = hh // 2, ww // 2
    w_slab = _build_slab_weights(out_weight, ww).astype(jnp.bfloat16)
    bias_wc = jnp.tile(out_bias.astype(jnp.float32), wo).reshape(1, -1)  # (1, Wo)
    out2d = _call_out_layer(a2d, w_slab, bias_wc, s_rows=ho)             # (N*Ho, Wo)
    return out2d.reshape(n, 1, ho, wo)                   # NCHW output (C_out = 1)


# ----------------------------------------------------------------------------
# Parameter init (normal_init(0, 0.02) conv weights; BN affine + biases given
# non-trivial values so those code paths are actually exercised)
# ----------------------------------------------------------------------------
def init_params(key, conv):
    conv_weights, conv_biases, bn_gammas, bn_betas = [], [], [], []
    for i in range(len(conv) - 1):
        key, k1, k2, k3, k4 = jax.random.split(key, 5)
        conv_weights.append(0.02 * jax.random.normal(
            k1, (conv[i + 1], conv[i], KERNEL, KERNEL), dtype=jnp.float32))
        conv_biases.append(0.1 * jax.random.normal(k2, (conv[i + 1],), jnp.float32))
        bn_gammas.append(1.0 + 0.1 * jax.random.normal(k3, (conv[i + 1],), jnp.float32))
        bn_betas.append(0.1 * jax.random.normal(k4, (conv[i + 1],), jnp.float32))
    key, k1, k2 = jax.random.split(key, 3)
    out_weight = 0.02 * jax.random.normal(k1, (1, conv[-1], KERNEL, KERNEL),
                                          dtype=jnp.float32)
    out_bias = 0.1 * jax.random.normal(k2, (1,), jnp.float32)
    return conv_weights, conv_biases, bn_gammas, bn_betas, out_weight, out_bias


# ----------------------------------------------------------------------------
# Pure-JAX f32 reference (mirrors the PyTorch module, training-mode BN)
# ----------------------------------------------------------------------------
def _reference_forward(x, y, conv_weights, conv_biases, bn_gammas, bn_betas,
                       out_weight, out_bias):
    dn = ("NCHW", "OIHW", "NCHW")
    h = jnp.concatenate([x, y], axis=1).astype(jnp.float32)
    for w, b, g, bt in zip(conv_weights, conv_biases, bn_gammas, bn_betas):
        z = jax.lax.conv_general_dilated(
            h, w, window_strides=(STRIDE, STRIDE),
            padding=((PAD, PAD), (PAD, PAD)), dimension_numbers=dn,
            precision=jax.lax.Precision.HIGHEST) + b.reshape(1, -1, 1, 1)
        mean = jnp.mean(z, axis=(0, 2, 3), keepdims=True)
        var = jnp.mean((z - mean) ** 2, axis=(0, 2, 3), keepdims=True)
        zn = (z - mean) * jax.lax.rsqrt(var + BN_EPS)
        zn = g.reshape(1, -1, 1, 1) * zn + bt.reshape(1, -1, 1, 1)
        h = jnp.where(zn > 0, zn, LRELU_SLOPE * zn)
    z = jax.lax.conv_general_dilated(
        h, out_weight, window_strides=(STRIDE, STRIDE),
        padding=((PAD, PAD), (PAD, PAD)), dimension_numbers=dn,
        precision=jax.lax.Precision.HIGHEST) + out_bias.reshape(1, -1, 1, 1)
    return 1.0 / (1.0 + jnp.exp(-z))


if __name__ == "__main__":
    key = jax.random.PRNGKey(0)
    kx, ky, kp = jax.random.split(key, 3)

    # x, y each (N=2, C=2, H=16, W=16); concat -> 4 channels = conv[0]
    conv = [4, 8, 16]
    x = jax.random.normal(kx, (2, 2, 16, 16), dtype=jnp.float32)
    y = jax.random.normal(ky, (2, 2, 16, 16), dtype=jnp.float32)

    params = init_params(kp, conv)

    out = discriminator_forward(x, y, *params)
    out = jax.block_until_ready(out)
    assert out.shape == (2, 1, 2, 2), out.shape
    assert bool(jnp.all(jnp.isfinite(out)))
    assert bool(jnp.all((out >= 0.0) & (out <= 1.0)))

    ref = jax.block_until_ready(_reference_forward(x, y, *params))
    max_err = float(jnp.max(jnp.abs(out - ref)))
    assert max_err < 2.5e-2, f"max |pallas - reference| = {max_err}"

    print("KERNEL_OK")
</pallas_src>

<mosaic_0001>
module attributes {stable_mosaic.version = 11 : i64} {
  func.func @kernel(%arg0: memref<16x128xbf16, #tpu.memory_space<vmem>>, %arg1: memref<3x128x64xbf16, #tpu.memory_space<vmem>>, %arg2: memref<64x8xf32, #tpu.memory_space<vmem>>, %arg3: memref<8x64xf32, #tpu.memory_space<vmem>>, %arg4: memref<1x8xf32, #tpu.memory_space<vmem>>, %arg5: memref<1x8xf32, #tpu.memory_space<vmem>>, %arg6: memref<16x64xbf16, #tpu.memory_space<vmem>>) attributes {dimension_semantics = [], scalar_prefetch = 0 : i64, scratch_operands = 0 : i64, tpu.core_type = #tpu.core_type<tc>} {
    %c0 = arith.constant 0 : index
    %c0_0 = arith.constant 0 : index
    %0 = vector.load %arg0[%c0, %c0_0] : memref<16x128xbf16, #tpu.memory_space<vmem>>, vector<16x128xbf16>
    %c0_1 = arith.constant 0 : index
    %c0_2 = arith.constant 0 : index
    %c0_3 = arith.constant 0 : index
    %1 = vector.load %arg1[%c0_1, %c0_2, %c0_3] : memref<3x128x64xbf16, #tpu.memory_space<vmem>>, vector<1x128x64xbf16>
    %2 = vector.shape_cast %1 : vector<1x128x64xbf16> to vector<128x64xbf16>
    %cst = arith.constant dense<0.000000e+00> : vector<16x64xf32>
    %3 = tpu.matmul %0, %2, %cst {dimension_numbers = #tpu.dot_dimension_numbers<[1], [0], [0], [1], [0, 0, 1, 1], [], []>} : vector<16x128xbf16>, vector<128x64xbf16>, vector<16x64xf32> -> vector<16x64xf32>
    %c1 = arith.constant 1 : index
    %c0_4 = arith.constant 0 : index
    %c0_5 = arith.constant 0 : index
    %4 = vector.load %arg1[%c1, %c0_4, %c0_5] : memref<3x128x64xbf16, #tpu.memory_space<vmem>>, vector<1x128x64xbf16>
    %5 = vector.shape_cast %4 : vector<1x128x64xbf16> to vector<128x64xbf16>
    %cst_6 = arith.constant dense<0.000000e+00> : vector<16x64xf32>
    %6 = tpu.matmul %0, %5, %cst_6 {dimension_numbers = #tpu.dot_dimension_numbers<[1], [0], [0], [1], [0, 0, 1, 1], [], []>} : vector<16x128xbf16>, vector<128x64xbf16>, vector<16x64xf32> -> vector<16x64xf32>
    %c2 = arith.constant 2 : index
    %c0_7 = arith.constant 0 : index
    %c0_8 = arith.constant 0 : index
    %7 = vector.load %arg1[%c2, %c0_7, %c0_8] : memref<3x128x64xbf16, #tpu.memory_space<vmem>>, vector<1x128x64xbf16>
    %8 = vector.shape_cast %7 : vector<1x128x64xbf16> to vector<128x64xbf16>
    %cst_9 = arith.constant dense<0.000000e+00> : vector<16x64xf32>
    %9 = tpu.matmul %0, %8, %cst_9 {dimension_numbers = #tpu.dot_dimension_numbers<[1], [0], [0], [1], [0, 0, 1, 1], [], []>} : vector<16x128xbf16>, vector<128x64xbf16>, vector<16x64xf32> -> vector<16x64xf32>
    %cst_10 = arith.constant 0.000000e+00 : f32
    %10 = vector.broadcast %cst_10 : f32 to vector<1x64xf32>
    %11 = vector.extract_strided_slice %3 {offsets = [0, 0], sizes = [15, 64], strides = [1, 1]} : vector<16x64xf32> to vector<15x64xf32>
    %12 = tpu.concatenate %10, %11 in 0 : vector<1x64xf32>, vector<15x64xf32> -> vector<16x64xf32>
    %13 = vector.extract_strided_slice %9 {offsets = [1, 0], sizes = [15, 64], strides = [1, 1]} : vector<16x64xf32> to vector<15x64xf32>
    %14 = tpu.concatenate %13, %10 in 0 : vector<15x64xf32>, vector<1x64xf32> -> vector<16x64xf32>
    %15 = tpu.iota {dimensions = array<i32: 0>} : vector<16x64xi32>
    %c8_i32 = arith.constant 8 : i32
    %c0_i32 = arith.constant 0 : i32
    %16 = arith.cmpi eq, %c8_i32, %c0_i32 : i32
    %c1_i32 = arith.constant 1 : i32
    %17 = arith.select %16, %c1_i32, %c8_i32 : i32
    %18 = vector.broadcast %17 : i32 to vector<16x64xi32>
    %19 = arith.remsi %15, %18 : vector<16x64xi32>
    %c0_i32_11 = arith.constant 0 : i32
    %20 = vector.broadcast %c0_i32_11 : i32 to vector<16x64xi32>
    %21 = arith.cmpi ne, %19, %20 : vector<16x64xi32>
    %c0_i32_12 = arith.constant 0 : i32
    %22 = vector.broadcast %c0_i32_12 : i32 to vector<16x64xi32>
    %23 = arith.cmpi slt, %19, %22 : vector<16x64xi32>
    %c0_i32_13 = arith.constant 0 : i32
    %24 = arith.cmpi slt, %17, %c0_i32_13 : i32
    %25 = vector.broadcast %24 : i1 to vector<16x64xi1>
    %26 = vector.broadcast %25 : vector<16x64xi1> to vector<16x64xi1>
    %27 = arith.xori %23, %26 : vector<16x64xi1>
    %28 = arith.andi %27, %21 : vector<16x64xi1>
    %29 = vector.broadcast %17 : i32 to vector<16x64xi32>
    %30 = arith.addi %19, %29 : vector<16x64xi32>
    %31 = arith.select %28, %30, %19 : vector<16x64xi1>, vector<16x64xi32>
    %c0_i32_14 = arith.constant 0 : i32
    %32 = vector.broadcast %c0_i32_14 : i32 to vector<16x64xi32>
    %33 = arith.cmpi eq, %31, %32 : vector<16x64xi32>
    %cst_15 = arith.constant 0.000000e+00 : f32
    %34 = vector.broadcast %cst_15 : f32 to vector<16x64xf32>
    %35 = arith.select %33, %34, %12 : vector<16x64xi1>, vector<16x64xf32>
    %36 = arith.addf %6, %35 : vector<16x64xf32>
    %c7_i32 = arith.constant 7 : i32
    %37 = vector.broadcast %c7_i32 : i32 to vector<16x64xi32>
    %38 = arith.cmpi eq, %31, %37 : vector<16x64xi32>
    %cst_16 = arith.constant 0.000000e+00 : f32
    %39 = vector.broadcast %cst_16 : f32 to vector<16x64xf32>
    %40 = arith.select %38, %39, %14 : vector<16x64xi1>, vector<16x64xf32>
    %41 = arith.addf %36, %40 : vector<16x64xf32>
    %c0_17 = arith.constant 0 : index
    %c0_18 = arith.constant 0 : index
    %42 = vector.load %arg2[%c0_17, %c0_18] : memref<64x8xf32, #tpu.memory_space<vmem>>, vector<64x8xf32>
    %c0_19 = arith.constant 0 : index
    %c0_20 = arith.constant 0 : index
    %43 = vector.load %arg3[%c0_19, %c0_20] : memref<8x64xf32, #tpu.memory_space<vmem>>, vector<8x64xf32>
    %cst_21 = arith.constant dense<0.000000e+00> : vector<64xf32>
    %44 = vector.multi_reduction <add>, %41, %cst_21 [0] : vector<16x64xf32> to vector<64xf32>
    %45 = vector.shape_cast %44 : vector<64xf32> to vector<1x64xf32>
    %cst_22 = arith.constant dense<0.000000e+00> : vector<1x8xf32>
    %46 = tpu.matmul %45, %42, %cst_22 {dimension_numbers = #tpu.dot_dimension_numbers<[1], [0], [0], [1], [0, 0, 1, 1], [], []>} : vector<1x64xf32>, vector<64x8xf32>, vector<1x8xf32> -> vector<1x8xf32>
    %cst_23 = arith.constant 7.812500e-03 : f32
    %47 = vector.broadcast %cst_23 : f32 to vector<1x8xf32>
    %48 = arith.mulf %46, %47 : vector<1x8xf32>
    %cst_24 = arith.constant dense<0.000000e+00> : vector<1x64xf32>
    %49 = tpu.matmul %48, %43, %cst_24 {dimension_numbers = #tpu.dot_dimension_numbers<[1], [0], [0], [1], [0, 0, 1, 1], [], []>} : vector<1x8xf32>, vector<8x64xf32>, vector<1x64xf32> -> vector<1x64xf32>
    %50 = vector.broadcast %49 : vector<1x64xf32> to vector<16x64xf32>
    %51 = arith.subf %41, %50 : vector<16x64xf32>
    %52 = arith.mulf %51, %51 : vector<16x64xf32>
    %cst_25 = arith.constant dense<0.000000e+00> : vector<64xf32>
    %53 = vector.multi_reduction <add>, %52, %cst_25 [0] : vector<16x64xf32> to vector<64xf32>
    %54 = vector.shape_cast %53 : vector<64xf32> to vector<1x64xf32>
    %cst_26 = arith.constant dense<0.000000e+00> : vector<1x8xf32>
    %55 = tpu.matmul %54, %42, %cst_26 {dimension_numbers = #tpu.dot_dimension_numbers<[1], [0], [0], [1], [0, 0, 1, 1], [], []>} : vector<1x64xf32>, vector<64x8xf32>, vector<1x8xf32> -> vector<1x8xf32>
    %cst_27 = arith.constant 7.812500e-03 : f32
    %56 = vector.broadcast %cst_27 : f32 to vector<1x8xf32>
    %57 = arith.mulf %55, %56 : vector<1x8xf32>
    %c0_28 = arith.constant 0 : index
    %c0_29 = arith.constant 0 : index
    %58 = vector.load %arg4[%c0_28, %c0_29] : memref<1x8xf32, #tpu.memory_space<vmem>>, vector<1x8xf32>
    %cst_30 = arith.constant 9.99999974E-6 : f32
    %59 = vector.broadcast %cst_30 : f32 to vector<1x8xf32>
    %60 = arith.addf %57, %59 : vector<1x8xf32>
    %61 = math.rsqrt %60 : vector<1x8xf32>
    %62 = arith.mulf %58, %61 : vector<1x8xf32>
    %cst_31 = arith.constant dense<0.000000e+00> : vector<1x64xf32>
    %63 = tpu.matmul %62, %43, %cst_31 {dimension_numbers = #tpu.dot_dimension_numbers<[1], [0], [0], [1], [0, 0, 1, 1], [], []>} : vector<1x8xf32>, vector<8x64xf32>, vector<1x64xf32> -> vector<1x64xf32>
    %64 = vector.broadcast %63 : vector<1x64xf32> to vector<16x64xf32>
    %65 = arith.mulf %51, %64 : vector<16x64xf32>
    %c0_32 = arith.constant 0 : index
    %c0_33 = arith.constant 0 : index
    %66 = vector.load %arg5[%c0_32, %c0_33] : memref<1x8xf32, #tpu.memory_space<vmem>>, vector<1x8xf32>
    %cst_34 = arith.constant dense<0.000000e+00> : vector<1x64xf32>
    %67 = tpu.matmul %66, %43, %cst_34 {dimension_numbers = #tpu.dot_dimension_numbers<[1], [0], [0], [1], [0, 0, 1, 1], [], []>} : vector<1x8xf32>, vector<8x64xf32>, vector<1x64xf32> -> vector<1x64xf32>
    %68 = vector.broadcast %67 : vector<1x64xf32> to vector<16x64xf32>
    %69 = arith.addf %65, %68 : vector<16x64xf32>
    %cst_35 = arith.constant 0.000000e+00 : f32
    %70 = vector.broadcast %cst_35 : f32 to vector<16x64xf32>
    %71 = arith.cmpf ogt, %69, %70 : vector<16x64xf32>
    %cst_36 = arith.constant 2.000000e-01 : f32
    %72 = vector.broadcast %cst_36 : f32 to vector<16x64xf32>
    %73 = arith.mulf %72, %69 : vector<16x64xf32>
    %74 = arith.select %71, %69, %73 : vector<16x64xi1>, vector<16x64xf32>
    %75 = arith.truncf %74 : vector<16x64xf32> to vector<16x64xbf16>
    %c0_37 = arith.constant 0 : index
    %c0_38 = arith.constant 0 : index
    %76 = vector.load %arg6[%c0_37, %c0_38] : memref<16x64xbf16, #tpu.memory_space<vmem>>, vector<16x64xbf16>
    tpu.vector_store %arg6[%c0_37, %c0_38], %75 {strides = array<i32>} : memref<16x64xbf16, #tpu.memory_space<vmem>>, vector<16x64xbf16>,
    return
  }
}

module attributes {stable_mosaic.version = 11 : i64} {
  func.func @kernel(%arg0: memref<8x128xbf16, #tpu.memory_space<vmem>>, %arg1: memref<3x128x64xbf16, #tpu.memory_space<vmem>>, %arg2: memref<64x16xf32, #tpu.memory_space<vmem>>, %arg3: memref<16x64xf32, #tpu.memory_space<vmem>>, %arg4: memref<1x16xf32, #tpu.memory_space<vmem>>, %arg5: memref<1x16xf32, #tpu.memory_space<vmem>>, %arg6: memref<8x64xbf16, #tpu.memory_space<vmem>>) attributes {dimension_semantics = [], scalar_prefetch = 0 : i64, scratch_operands = 0 : i64, tpu.core_type = #tpu.core_type<tc>} {
    %c0 = arith.constant 0 : index
    %c0_0 = arith.constant 0 : index
    %0 = vector.load %arg0[%c0, %c0_0] : memref<8x128xbf16, #tpu.memory_space<vmem>>, vector<8x128xbf16>
    %c0_1 = arith.constant 0 : index
    %c0_2 = arith.constant 0 : index
    %c0_3 = arith.constant 0 : index
    %1 = vector.load %arg1[%c0_1, %c0_2, %c0_3] : memref<3x128x64xbf16, #tpu.memory_space<vmem>>, vector<1x128x64xbf16>
    %2 = vector.shape_cast %1 : vector<1x128x64xbf16> to vector<128x64xbf16>
    %cst = arith.constant dense<0.000000e+00> : vector<8x64xf32>
    %3 = tpu.matmul %0, %2, %cst {dimension_numbers = #tpu.dot_dimension_numbers<[1], [0], [0], [1], [0, 0, 1, 1], [], []>} : vector<8x128xbf16>, vector<128x64xbf16>, vector<8x64xf32> -> vector<8x64xf32>
    %c1 = arith.constant 1 : index
    %c0_4 = arith.constant 0 : index
    %c0_5 = arith.constant 0 : index
    %4 = vector.load %arg1[%c1, %c0_4, %c0_5] : memref<3x128x64xbf16, #tpu.memory_space<vmem>>, vector<1x128x64xbf16>
    %5 = vector.shape_cast %4 : vector<1x128x64xbf16> to vector<128x64xbf16>
    %cst_6 = arith.constant dense<0.000000e+00> : vector<8x64xf32>
    %6 = tpu.matmul %0, %5, %cst_6 {dimension_numbers = #tpu.dot_dimension_numbers<[1], [0], [0], [1], [0, 0, 1, 1], [], []>} : vector<8x128xbf16>, vector<128x64xbf16>, vector<8x64xf32> -> vector<8x64xf32>
    %c2 = arith.constant 2 : index
    %c0_7 = arith.constant 0 : index
    %c0_8 = arith.constant 0 : index
    %7 = vector.load %arg1[%c2, %c0_7, %c0_8] : memref<3x128x64xbf16, #tpu.memory_space<vmem>>, vector<1x128x64xbf16>
    %8 = vector.shape_cast %7 : vector<1x128x64xbf16> to vector<128x64xbf16>
    %cst_9 = arith.constant dense<0.000000e+00> : vector<8x64xf32>
    %9 = tpu.matmul %0, %8, %cst_9 {dimension_numbers = #tpu.dot_dimension_numbers<[1], [0], [0], [1], [0, 0, 1, 1], [], []>} : vector<8x128xbf16>, vector<128x64xbf16>, vector<8x64xf32> -> vector<8x64xf32>
    %cst_10 = arith.constant 0.000000e+00 : f32
    %10 = vector.broadcast %cst_10 : f32 to vector<1x64xf32>
    %11 = vector.extract_strided_slice %3 {offsets = [0, 0], sizes = [7, 64], strides = [1, 1]} : vector<8x64xf32> to vector<7x64xf32>
    %12 = tpu.concatenate %10, %11 in 0 : vector<1x64xf32>, vector<7x64xf32> -> vector<8x64xf32>
    %13 = vector.extract_strided_slice %9 {offsets = [1, 0], sizes = [7, 64], strides = [1, 1]} : vector<8x64xf32> to vector<7x64xf32>
    %14 = tpu.concatenate %13, %10 in 0 : vector<7x64xf32>, vector<1x64xf32> -> vector<8x64xf32>
    %15 = tpu.iota {dimensions = array<i32: 0>} : vector<8x64xi32>
    %c4_i32 = arith.constant 4 : i32
    %c0_i32 = arith.constant 0 : i32
    %16 = arith.cmpi eq, %c4_i32, %c0_i32 : i32
    %c1_i32 = arith.constant 1 : i32
    %17 = arith.select %16, %c1_i32, %c4_i32 : i32
    %18 = vector.broadcast %17 : i32 to vector<8x64xi32>
    %19 = arith.remsi %15, %18 : vector<8x64xi32>
    %c0_i32_11 = arith.constant 0 : i32
    %20 = vector.broadcast %c0_i32_11 : i32 to vector<8x64xi32>
    %21 = arith.cmpi ne, %19, %20 : vector<8x64xi32>
    %c0_i32_12 = arith.constant 0 : i32
    %22 = vector.broadcast %c0_i32_12 : i32 to vector<8x64xi32>
    %23 = arith.cmpi slt, %19, %22 : vector<8x64xi32>
    %c0_i32_13 = arith.constant 0 : i32
    %24 = arith.cmpi slt, %17, %c0_i32_13 : i32
    %25 = vector.broadcast %24 : i1 to vector<8x64xi1>
    %26 = vector.broadcast %25 : vector<8x64xi1> to vector<8x64xi1>
    %27 = arith.xori %23, %26 : vector<8x64xi1>
    %28 = arith.andi %27, %21 : vector<8x64xi1>
    %29 = vector.broadcast %17 : i32 to vector<8x64xi32>
    %30 = arith.addi %19, %29 : vector<8x64xi32>
    %31 = arith.select %28, %30, %19 : vector<8x64xi1>, vector<8x64xi32>
    %c0_i32_14 = arith.constant 0 : i32
    %32 = vector.broadcast %c0_i32_14 : i32 to vector<8x64xi32>
    %33 = arith.cmpi eq, %31, %32 : vector<8x64xi32>
    %cst_15 = arith.constant 0.000000e+00 : f32
    %34 = vector.broadcast %cst_15 : f32 to vector<8x64xf32>
    %35 = arith.select %33, %34, %12 : vector<8x64xi1>, vector<8x64xf32>
    %36 = arith.addf %6, %35 : vector<8x64xf32>
    %c3_i32 = arith.constant 3 : i32
    %37 = vector.broadcast %c3_i32 : i32 to vector<8x64xi32>
    %38 = arith.cmpi eq, %31, %37 : vector<8x64xi32>
    %cst_16 = arith.constant 0.000000e+00 : f32
    %39 = vector.broadcast %cst_16 : f32 to vector<8x64xf32>
    %40 = arith.select %38, %39, %14 : vector<8x64xi1>, vector<8x64xf32>
    %41 = arith.addf %36, %40 : vector<8x64xf32>
    %c0_17 = arith.constant 0 : index
    %c0_18 = arith.constant 0 : index
    %42 = vector.load %arg2[%c0_17, %c0_18] : memref<64x16xf32, #tpu.memory_space<vmem>>, vector<64x16xf32>
    %c0_19 = arith.constant 0 : index
    %c0_20 = arith.constant 0 : index
    %43 = vector.load %arg3[%c0_19, %c0_20] : memref<16x64xf32, #tpu.memory_space<vmem>>, vector<16x64xf32>
    %cst_21 = arith.constant dense<0.000000e+00> : vector<64xf32>
    %44 = vector.multi_reduction <add>, %41, %cst_21 [0] : vector<8x64xf32> to vector<64xf32>
    %45 = vector.shape_cast %44 : vector<64xf32> to vector<1x64xf32>
    %cst_22 = arith.constant dense<0.000000e+00> : vector<1x16xf32>
    %46 = tpu.matmul %45, %42, %cst_22 {dimension_numbers = #tpu.dot_dimension_numbers<[1], [0], [0], [1], [0, 0, 1, 1], [], []>} : vector<1x64xf32>, vector<64x16xf32>, vector<1x16xf32> -> vector<1x16xf32>
    %cst_23 = arith.constant 3.125000e-02 : f32
    %47 = vector.broadcast %cst_23 : f32 to vector<1x16xf32>
    %48 = arith.mulf %46, %47 : vector<1x16xf32>
    %cst_24 = arith.constant dense<0.000000e+00> : vector<1x64xf32>
    %49 = tpu.matmul %48, %43, %cst_24 {dimension_numbers = #tpu.dot_dimension_numbers<[1], [0], [0], [1], [0, 0, 1, 1], [], []>} : vector<1x16xf32>, vector<16x64xf32>, vector<1x64xf32> -> vector<1x64xf32>
    %50 = vector.broadcast %49 : vector<1x64xf32> to vector<8x64xf32>
    %51 = arith.subf %41, %50 : vector<8x64xf32>
    %52 = arith.mulf %51, %51 : vector<8x64xf32>
    %cst_25 = arith.constant dense<0.000000e+00> : vector<64xf32>
    %53 = vector.multi_reduction <add>, %52, %cst_25 [0] : vector<8x64xf32> to vector<64xf32>
    %54 = vector.shape_cast %53 : vector<64xf32> to vector<1x64xf32>
    %cst_26 = arith.constant dense<0.000000e+00> : vector<1x16xf32>
    %55 = tpu.matmul %54, %42, %cst_26 {dimension_numbers = #tpu.dot_dimension_numbers<[1], [0], [0], [1], [0, 0, 1, 1], [], []>} : vector<1x64xf32>, vector<64x16xf32>, vector<1x16xf32> -> vector<1x16xf32>
    %cst_27 = arith.constant 3.125000e-02 : f32
    %56 = vector.broadcast %cst_27 : f32 to vector<1x16xf32>
    %57 = arith.mulf %55, %56 : vector<1x16xf32>
    %c0_28 = arith.constant 0 : index
    %c0_29 = arith.constant 0 : index
    %58 = vector.load %arg4[%c0_28, %c0_29] : memref<1x16xf32, #tpu.memory_space<vmem>>, vector<1x16xf32>
    %cst_30 = arith.constant 9.99999974E-6 : f32
    %59 = vector.broadcast %cst_30 : f32 to vector<1x16xf32>
    %60 = arith.addf %57, %59 : vector<1x16xf32>
    %61 = math.rsqrt %60 : vector<1x16xf32>
    %62 = arith.mulf %58, %61 : vector<1x16xf32>
    %cst_31 = arith.constant dense<0.000000e+00> : vector<1x64xf32>
    %63 = tpu.matmul %62, %43, %cst_31 {dimension_numbers = #tpu.dot_dimension_numbers<[1], [0], [0], [1], [0, 0, 1, 1], [], []>} : vector<1x16xf32>, vector<16x64xf32>, vector<1x64xf32> -> vector<1x64xf32>
    %64 = vector.broadcast %63 : vector<1x64xf32> to vector<8x64xf32>
    %65 = arith.mulf %51, %64 : vector<8x64xf32>
    %c0_32 = arith.constant 0 : index
    %c0_33 = arith.constant 0 : index
    %66 = vector.load %arg5[%c0_32, %c0_33] : memref<1x16xf32, #tpu.memory_space<vmem>>, vector<1x16xf32>
    %cst_34 = arith.constant dense<0.000000e+00> : vector<1x64xf32>
    %67 = tpu.matmul %66, %43, %cst_34 {dimension_numbers = #tpu.dot_dimension_numbers<[1], [0], [0], [1], [0, 0, 1, 1], [], []>} : vector<1x16xf32>, vector<16x64xf32>, vector<1x64xf32> -> vector<1x64xf32>
    %68 = vector.broadcast %67 : vector<1x64xf32> to vector<8x64xf32>
    %69 = arith.addf %65, %68 : vector<8x64xf32>
    %cst_35 = arith.constant 0.000000e+00 : f32
    %70 = vector.broadcast %cst_35 : f32 to vector<8x64xf32>
    %71 = arith.cmpf ogt, %69, %70 : vector<8x64xf32>
    %cst_36 = arith.constant 2.000000e-01 : f32
    %72 = vector.broadcast %cst_36 : f32 to vector<8x64xf32>
    %73 = arith.mulf %72, %69 : vector<8x64xf32>
    %74 = arith.select %71, %69, %73 : vector<8x64xi1>, vector<8x64xf32>
    %75 = arith.truncf %74 : vector<8x64xf32> to vector<8x64xbf16>
    %c0_37 = arith.constant 0 : index
    %c0_38 = arith.constant 0 : index
    %76 = vector.load %arg6[%c0_37, %c0_38] : memref<8x64xbf16, #tpu.memory_space<vmem>>, vector<8x64xbf16>
    tpu.vector_store %arg6[%c0_37, %c0_38], %75 {strides = array<i32>} : memref<8x64xbf16, #tpu.memory_space<vmem>>, vector<8x64xbf16>,
    return
  }
}

module attributes {stable_mosaic.version = 11 : i64} {
  func.func @kernel(%arg0: memref<4x128xbf16, #tpu.memory_space<vmem>>, %arg1: memref<3x128x2xbf16, #tpu.memory_space<vmem>>, %arg2: memref<1x2xf32, #tpu.memory_space<vmem>>, %arg3: memref<4x2xf32, #tpu.memory_space<vmem>>) attributes {dimension_semantics = [], scalar_prefetch = 0 : i64, scratch_operands = 0 : i64, tpu.core_type = #tpu.core_type<tc>} {
    %c0 = arith.constant 0 : index
    %c0_0 = arith.constant 0 : index
    %0 = vector.load %arg0[%c0, %c0_0] : memref<4x128xbf16, #tpu.memory_space<vmem>>, vector<4x128xbf16>
    %c0_1 = arith.constant 0 : index
    %c0_2 = arith.constant 0 : index
    %c0_3 = arith.constant 0 : index
    %1 = vector.load %arg1[%c0_1, %c0_2, %c0_3] : memref<3x128x2xbf16, #tpu.memory_space<vmem>>, vector<1x128x2xbf16>
    %2 = vector.shape_cast %1 : vector<1x128x2xbf16> to vector<128x2xbf16>
    %cst = arith.constant dense<0.000000e+00> : vector<4x2xf32>
    %3 = tpu.matmul %0, %2, %cst {dimension_numbers = #tpu.dot_dimension_numbers<[1], [0], [0], [1], [0, 0, 1, 1], [], []>} : vector<4x128xbf16>, vector<128x2xbf16>, vector<4x2xf32> -> vector<4x2xf32>
    %c1 = arith.constant 1 : index
    %c0_4 = arith.constant 0 : index
    %c0_5 = arith.constant 0 : index
    %4 = vector.load %arg1[%c1, %c0_4, %c0_5] : memref<3x128x2xbf16, #tpu.memory_space<vmem>>, vector<1x128x2xbf16>
    %5 = vector.shape_cast %4 : vector<1x128x2xbf16> to vector<128x2xbf16>
    %cst_6 = arith.constant dense<0.000000e+00> : vector<4x2xf32>
    %6 = tpu.matmul %0, %5, %cst_6 {dimension_numbers = #tpu.dot_dimension_numbers<[1], [0], [0], [1], [0, 0, 1, 1], [], []>} : vector<4x128xbf16>, vector<128x2xbf16>, vector<4x2xf32> -> vector<4x2xf32>
    %c2 = arith.constant 2 : index
    %c0_7 = arith.constant 0 : index
    %c0_8 = arith.constant 0 : index
    %7 = vector.load %arg1[%c2, %c0_7, %c0_8] : memref<3x128x2xbf16, #tpu.memory_space<vmem>>, vector<1x128x2xbf16>
    %8 = vector.shape_cast %7 : vector<1x128x2xbf16> to vector<128x2xbf16>
    %cst_9 = arith.constant dense<0.000000e+00> : vector<4x2xf32>
    %9 = tpu.matmul %0, %8, %cst_9 {dimension_numbers = #tpu.dot_dimension_numbers<[1], [0], [0], [1], [0, 0, 1, 1], [], []>} : vector<4x128xbf16>, vector<128x2xbf16>, vector<4x2xf32> -> vector<4x2xf32>
    %cst_10 = arith.constant 0.000000e+00 : f32
    %10 = vector.broadcast %cst_10 : f32 to vector<1x2xf32>
    %11 = vector.extract_strided_slice %3 {offsets = [0, 0], sizes = [3, 2], strides = [1, 1]} : vector<4x2xf32> to vector<3x2xf32>
    %12 = tpu.concatenate %10, %11 in 0 : vector<1x2xf32>, vector<3x2xf32> -> vector<4x2xf32>
    %13 = vector.extract_strided_slice %9 {offsets = [1, 0], sizes = [3, 2], strides = [1, 1]} : vector<4x2xf32> to vector<3x2xf32>
    %14 = tpu.concatenate %13, %10 in 0 : vector<3x2xf32>, vector<1x2xf32> -> vector<4x2xf32>
    %15 = tpu.iota {dimensions = array<i32: 0>} : vector<4x2xi32>
    %c2_i32 = arith.constant 2 : i32
    %c0_i32 = arith.constant 0 : i32
    %16 = arith.cmpi eq, %c2_i32, %c0_i32 : i32
    %c1_i32 = arith.constant 1 : i32
    %17 = arith.select %16, %c1_i32, %c2_i32 : i32
    %18 = vector.broadcast %17 : i32 to vector<4x2xi32>
    %19 = arith.remsi %15, %18 : vector<4x2xi32>
    %c0_i32_11 = arith.constant 0 : i32
    %20 = vector.broadcast %c0_i32_11 : i32 to vector<4x2xi32>
    %21 = arith.cmpi ne, %19, %20 : vector<4x2xi32>
    %c0_i32_12 = arith.constant 0 : i32
    %22 = vector.broadcast %c0_i32_12 : i32 to vector<4x2xi32>
    %23 = arith.cmpi slt, %19, %22 : vector<4x2xi32>
    %c0_i32_13 = arith.constant 0 : i32
    %24 = arith.cmpi slt, %17, %c0_i32_13 : i32
    %25 = vector.broadcast %24 : i1 to vector<4x2xi1>
    %26 = vector.broadcast %25 : vector<4x2xi1> to vector<4x2xi1>
    %27 = arith.xori %23, %26 : vector<4x2xi1>
    %28 = arith.andi %27, %21 : vector<4x2xi1>
    %29 = vector.broadcast %17 : i32 to vector<4x2xi32>
    %30 = arith.addi %19, %29 : vector<4x2xi32>
    %31 = arith.select %28, %30, %19 : vector<4x2xi1>, vector<4x2xi32>
    %c0_i32_14 = arith.constant 0 : i32
    %32 = vector.broadcast %c0_i32_14 : i32 to vector<4x2xi32>
    %33 = arith.cmpi eq, %31, %32 : vector<4x2xi32>
    %cst_15 = arith.constant 0.000000e+00 : f32
    %34 = vector.broadcast %cst_15 : f32 to vector<4x2xf32>
    %35 = arith.select %33, %34, %12 : vector<4x2xi1>, vector<4x2xf32>
    %36 = arith.addf %6, %35 : vector<4x2xf32>
    %c1_i32_16 = arith.constant 1 : i32
    %37 = vector.broadcast %c1_i32_16 : i32 to vector<4x2xi32>
    %38 = arith.cmpi eq, %31, %37 : vector<4x2xi32>
    %cst_17 = arith.constant 0.000000e+00 : f32
    %39 = vector.broadcast %cst_17 : f32 to vector<4x2xf32>
    %40 = arith.select %38, %39, %14 : vector<4x2xi1>, vector<4x2xf32>
    %41 = arith.addf %36, %40 : vector<4x2xf32>
    %c0_18 = arith.constant 0 : index
    %c0_19 = arith.constant 0 : index
    %42 = vector.load %arg2[%c0_18, %c0_19] : memref<1x2xf32, #tpu.memory_space<vmem>>, vector<1x2xf32>
    %43 = vector.broadcast %42 : vector<1x2xf32> to vector<4x2xf32>
    %44 = arith.addf %41, %43 : vector<4x2xf32>
    %cst_20 = arith.constant 0.000000e+00 : f32
    %45 = vector.broadcast %cst_20 : f32 to vector<4x2xf32>
    %46 = arith.subf %45, %44 : vector<4x2xf32>
    %47 = math.exp %46 : vector<4x2xf32>
    %cst_21 = arith.constant 1.000000e+00 : f32
    %48 = vector.broadcast %cst_21 : f32 to vector<4x2xf32>
    %49 = arith.addf %48, %47 : vector<4x2xf32>
    %cst_22 = arith.constant 1.000000e+00 : f32
    %50 = vector.broadcast %cst_22 : f32 to vector<4x2xf32>
    %51 = arith.divf %50, %49 : vector<4x2xf32>
    %c0_23 = arith.constant 0 : index
    %c0_24 = arith.constant 0 : index
    %52 = vector.load %arg3[%c0_23, %c0_24] : memref<4x2xf32, #tpu.memory_space<vmem>>, vector<4x2xf32>
    tpu.vector_store %arg3[%c0_23, %c0_24], %51 {strides = array<i32>} : memref<4x2xf32, #tpu.memory_space<vmem>>, vector<4x2xf32>,
    return
  }
}

</mosaic_0001>

<bundles_post_ra>
// kernel: tile.19
= control target key start
LH: loop header
LB: loop body
LE: loop exit
PB: predicated region body
PF: predicated region fallthrough
CT: control target
= control target key end

     0   :  { %vm4_vm0 = vcmask 1047556   ;;  %s99_s14 = smov 56   ;;  %s100_s19 = smov 40   ;;  %vm6_vm1 = vcmask 64512   ;;  %vm16_vm2 = vcmask 523712   ;;  %vm26_vm3 = vcmask 458112   ;;  %s196_s0 = inlined_call_operand.vmem [shape: f32[8,8,8], index: 0, kind: input, shape index: {}]   ;;  %s197_s1 = inlined_call_operand.vmem [shape: f32[64,8], index: 1, kind: output, shape index: {}]  }
   0x1   :  { %v78_v0 = vld [vmem:[%s196_s0 + $0x7] ss:$8 sm:$0xf]   ;;  %v82_v3 = vld [vmem:[%s196_s0 + $0x5] ss:$8 sm:$0xf]  }
   0x2   :  { %v79_v1 = vld [vmem:[%s196_s0 + $0x7] ss:$8 sm:$0xf0]   ;;  %v83_v4 = vld [vmem:[%s196_s0 + $0x5] ss:$8 sm:$0xf0]  }
   0x3   :  { %v13_v2 = vsel %vm4_vm0, %v79_v1, %v78_v0  ;;  %v33_v5 = vsel %vm4_vm0, %v83_v4, %v82_v3  ;;  %v80_v6 = vld [vmem:[%s196_s0 + $0x6] ss:$8 sm:$0xf]   ;;  %v84_v9 = vld [vmem:[%s196_s0 + $0x4] ss:$8 sm:$0xf]  }
   0x4   :  { %14 = vrot.lane.b32.xlu0 %v13_v2, %s99_s14  ;;  %v81_v7 = vld [vmem:[%s196_s0 + $0x6] ss:$8 sm:$0xf0]   ;;  %34 = vrot.lane.b32.xlu1 %v33_v5, %s100_s19  ;;  %v85_v10 = vld [vmem:[%s196_s0 + $0x4] ss:$8 sm:$0xf0]  }
   0x5   :  { %v23_v8 = vsel %vm4_vm0, %v81_v7, %v80_v6  ;;  %v86_v11 = vld [vmem:[%s196_s0 + $0x3] ss:$8 sm:$0xf]   ;;  %v43_v12 = vsel %vm4_vm0, %v85_v10, %v84_v9  ;;  %s101_s28 = smov 48   ;;  %s102_s4 = smov 32   ;;  %vm36_vm4 = vcmask 392512  }
   0x6   :  { %v87_v13 = vld [vmem:[%s196_s0 + $0x3] ss:$8 sm:$0xf0]   ;;  %v88_v14 = vld [vmem:[%s196_s0 + $0x2] ss:$8 sm:$0xf]  }
   0x7   :  { %v89_v15 = vld [vmem:[%s196_s0 + $0x2] ss:$8 sm:$0xf0]   ;;  %v53_v16 = vsel %vm4_vm0, %v87_v13, %v86_v11  ;;  %v90_v17 = vld [vmem:[%s196_s0 + $0x1] ss:$8 sm:$0xf]  }
   0x8   :  { %24 = vrot.lane.b32.xlu0 %v23_v8, %s101_s28  ;;  %44 = vrot.lane.b32.xlu1 %v43_v12, %s102_s4  ;;  %v63_v18 = vsel %vm4_vm0, %v89_v15, %v88_v14  ;;  %v91_v19 = vld [vmem:[%s196_s0 + $0x1] ss:$8 sm:$0xf0]   ;;  %v2_v20 = vld [vmem:[%s196_s0] ss:$8 sm:$0xf]  }
   0x9   :  { %v3_v21 = vld [vmem:[%s196_s0] ss:$8 sm:$0xf0]   ;;  %s103_s0 = smov 24   ;;  %s104_s13 = smov 16   ;;  %v73_v23 = vsel %vm4_vm0, %v91_v19, %v90_v17  ;;  %vm46_vm5 = vcmask 326912  }
   0xa   :  { %v5_v22 = vsel %vm4_vm0, %v3_v21, %v2_v20  ;;  %s105_s16 = smov 8   ;;  %vm56_vm6 = vcmask 261312   ;;  %vm66_vm7 = vcmask 195712   ;;  %vm76_vm8 = vcmask 130112  }
   0xb   :  { %7 = vst.msk [vmem:[%s197_s1] sm:$0xff] %vm6_vm1, %v5_v22  }
   0xc   :  { %54 = vrot.lane.b32.xlu0 %v53_v16, %s103_s0  ;;  %64 = vrot.lane.b32.xlu1 %v63_v18, %s104_s13 }
  0x10   :  { %74 = vrot.lane.b32.xlu0 %v73_v23, %s105_s16 }
  0x76   :  { %v15_v24 = vpop.permute.xlu0 %14   ;;  %v35_v25 = vpop.permute.xlu1 %34  }
  0x77   :  { %17 = vst.msk [vmem:[%s197_s1] sm:$0xff] %vm16_vm2, %v15_v24  }
  0x7a   :  { %v25_v26 = vpop.permute.xlu0 %24   ;;  %v45_v27 = vpop.permute.xlu1 %44  }
  0x7b   :  { %27 = vst.msk [vmem:[%s197_s1] sm:$0xff] %vm26_vm3, %v25_v26  }
  0x7c   :  { %37 = vst.msk [vmem:[%s197_s1] sm:$0xff] %vm36_vm4, %v35_v25  }
  0x7d   :  { %47 = vst.msk [vmem:[%s197_s1] sm:$0xff] %vm46_vm5, %v45_v27  }
  0x7e   :  { %v55_v28 = vpop.permute.xlu0 %54   ;;  %v65_v29 = vpop.permute.xlu1 %64  }
  0x7f   :  { %57 = vst.msk [vmem:[%s197_s1] sm:$0xff] %vm56_vm6, %v55_v28  }
  0x80   :  { %67 = vst.msk [vmem:[%s197_s1] sm:$0xff] %vm66_vm7, %v65_v29  }
  0x82   :  { %v75_v30 = vpop.permute.xlu0 %74  }
  0x83   :  { %77 = vst.msk [vmem:[%s197_s1] sm:$0xff] %vm76_vm8, %v75_v30  }

// kernel: tile.24
= control target key start
LH: loop header
LB: loop body
LE: loop exit
PB: predicated region body
PF: predicated region fallthrough
CT: control target
= control target key end

     0   :  { %vm82_vm0 = vcmask 1047556   ;;  %vm84_vm1 = vcmask 130048   ;;  %s195_s9 = smov 48   ;;  %s196_s14 = smov 16   ;;  %vm103_vm2 = vcmask 523648   ;;  %vm124_vm3 = vcmask 392448   ;;  %s289_s0 = inlined_call_operand.vmem [shape: f32[4,16,16], index: 0, kind: input, shape index: {}]   ;;  %s290_s1 = inlined_call_operand.vmem [shape: f32[64,16], index: 1, kind: output, shape index: {}]  }
   0x1   :  { %v180_v0 = vld [vmem:[%s289_s0 + $0x1c] sm:$0xf]  ;;  %v181_v1 = vld [vmem:[%s289_s0 + $0x18] sm:$0xf]  ;;  %v182_v2 = vld [vmem:[%s289_s0 + $0x14] sm:$0xf] }
   0x2   :  { %48 = vst [vmem:[#allocation0 + $0x38] sm:$0xf] %v180_v0  ;;  %53 = vst [vmem:[#allocation0 + $0x30] sm:$0xf] %v181_v1  ;;  %v183_v3 = vld [vmem:[%s289_s0 + $0x10] sm:$0xf] }
   0x3   :  { %58 = vst [vmem:[#allocation0 + $0x28] sm:$0xf] %v182_v2  ;;  %v184_v4 = vld [vmem:[%s289_s0 + $0xc] sm:$0xf]  ;;  %v185_v5 = vld [vmem:[%s289_s0 + $0x8] sm:$0xf] }
   0x4   :  { %63 = vst [vmem:[#allocation0 + $0x20] sm:$0xf] %v183_v3  ;;  %68 = vst [vmem:[#allocation0 + $0x18] sm:$0xf] %v184_v4  ;;  %v186_v6 = vld [vmem:[%s289_s0 + $0x4] sm:$0xf] }
   0x5   :  { %73 = vst [vmem:[#allocation0 + $0x10] sm:$0xf] %v185_v5  ;;  %v78_v7 = vld [vmem:[%s289_s0] sm:$0xf]  ;;  %77 = vst [vmem:[#allocation0 + $0x8] sm:$0xf] %v186_v6 }
   0x6   :  { %79 = vst [vmem:[#allocation0] sm:$0xf] %v78_v7  ;;  %v172_v8 = vld [vmem:[%s289_s0 + $0x3c] sm:$0xf]  ;;  %v173_v9 = vld [vmem:[%s289_s0 + $0x38] sm:$0xf] }
   0x7   :  { %8 = vst [vmem:[#allocation0 + $0x78] sm:$0xf] %v172_v8  ;;  %13 = vst [vmem:[#allocation0 + $0x70] sm:$0xf] %v173_v9  ;;  %v174_v10 = vld [vmem:[%s289_s0 + $0x34] sm:$0xf] }
   0x8   :  { %v175_v11 = vld [vmem:[%s289_s0 + $0x30] sm:$0xf]  ;;  %v176_v12 = vld [vmem:[%s289_s0 + $0x2c] sm:$0xf]  ;;  %18 = vst [vmem:[#allocation0 + $0x68] sm:$0xf] %v174_v10 }
   0x9   :  { %23 = vst [vmem:[#allocation0 + $0x60] sm:$0xf] %v175_v11  ;;  %28 = vst [vmem:[#allocation0 + $0x58] sm:$0xf] %v176_v12  ;;  %v177_v13 = vld [vmem:[%s289_s0 + $0x28] sm:$0xf] }
   0xa   :  { %v178_v14 = vld [vmem:[%s289_s0 + $0x24] sm:$0xf]  ;;  %v179_v15 = vld [vmem:[%s289_s0 + $0x20] sm:$0xf]  ;;  %33 = vst [vmem:[#allocation0 + $0x50] sm:$0xf] %v177_v13 }
   0xb   :  { %38 = vst [vmem:[#allocation0 + $0x48] sm:$0xf] %v178_v14  ;;  %43 = vst [vmem:[#allocation0 + $0x40] sm:$0xf] %v179_v15  ;;  %s194_s0 = smov 32   ;;  %vm145_vm4 = vcmask 261248  }
   0xc   :  { %v119_v16 = vld [vmem:[#allocation0 + $0x2] ss:$8 sm:$0xf0]   ;;  %v98_v17 = vld [vmem:[#allocation0 + $0x3] ss:$8 sm:$0xf0]  }
   0xd   :  { %v117_v18 = vld [vmem:[#allocation0 + $0x2] ss:$8 sm:$0xf]   ;;  %v96_v19 = vld [vmem:[#allocation0 + $0x3] ss:$8 sm:$0xf]  }
   0xe   :  { %v121_v20 = vsel %vm82_vm0, %v119_v16, %v117_v18  ;;  %v100_v21 = vsel %vm82_vm0, %v98_v17, %v96_v19  ;;  %v138_v24 = vld [vmem:[#allocation0 + $0x1] ss:$8 sm:$0xf]   ;;  %v80_v32 = vld [vmem:[#allocation0] ss:$8 sm:$0xf]  }
   0xf   :  { %122 = vrot.lane.b32.xlu1 %v121_v20, %s194_s0  ;;  %101 = vrot.lane.b32.xlu0 %v100_v21, %s195_s9  ;;  %v140_v25 = vld [vmem:[#allocation0 + $0x1] ss:$8 sm:$0xf0]   ;;  %v81_v33 = vld [vmem:[#allocation0] ss:$8 sm:$0xf0]  }
  0x10   :  { %v129_v22 = vld [vmem:[#allocation0 + $0x42] ss:$8 sm:$0xf0]   ;;  %v108_v23 = vld [vmem:[#allocation0 + $0x43] ss:$8 sm:$0xf0]   ;;  %v83_v34 = vsel %vm82_vm0, %v81_v33, %v80_v32  ;;  %v142_v38 = vsel %vm82_vm0, %v140_v25, %v138_v24 }
  0x11   :  { %v150_v31 = vld [vmem:[#allocation0 + $0x41] ss:$8 sm:$0xf0]   ;;  %v89_v36 = vld [vmem:[#allocation0 + $0x40] ss:$8 sm:$0xf0]  }
  0x12   :  { %v127_v26 = vld [vmem:[#allocation0 + $0x42] ss:$8 sm:$0xf]   ;;  %v106_v27 = vld [vmem:[#allocation0 + $0x43] ss:$8 sm:$0xf]  }
  0x13   :  { %v131_v28 = vsel %vm82_vm0, %v129_v22, %v127_v26  ;;  %v110_v29 = vsel %vm82_vm0, %v108_v23, %v106_v27  ;;  %v148_v30 = vld [vmem:[#allocation0 + $0x41] ss:$8 sm:$0xf]   ;;  %v87_v35 = vld [vmem:[#allocation0 + $0x40] ss:$8 sm:$0xf]  }
  0x14   :  { %132 = vrot.lane.b32.xlu1 %v131_v28, %s194_s0  ;;  %111 = vrot.lane.b32.xlu0 %v110_v29, %s195_s9  ;;  %v152_v37 = vsel %vm82_vm0, %v150_v31, %v148_v30  ;;  %85 = vst.msk [vmem:[%s290_s1] sm:$0xff] %vm84_vm1, %v83_v34   ;;  %v91_v39 = vsel %vm82_vm0, %v89_v36, %v87_v35 }
  0x15   :  { %187 = vst.msk [vmem:[%s290_s1 + $0x8] sm:$0xff] %vm84_vm1, %v91_v39  }
  0x18   :  { %153 = vrot.lane.b32.xlu1 %v152_v37, %s196_s14  ;;  %143 = vrot.lane.b32.xlu0 %v142_v38, %s196_s14 }
  0x81   :  { %v123_v40 = vpop.permute.xlu1 %122   ;;  %v102_v41 = vpop.permute.xlu0 %101  }
  0x82   :  { %104 = vst.msk [vmem:[%s290_s1] sm:$0xff] %vm103_vm2, %v102_v41  }
  0x83   :  { %125 = vst.msk [vmem:[%s290_s1] sm:$0xff] %vm124_vm3, %v123_v40  }
  0x86   :  { %v133_v42 = vpop.permute.xlu1 %132   ;;  %v112_v43 = vpop.permute.xlu0 %111  }
  0x87   :  { %188 = vst.msk [vmem:[%s290_s1 + $0x8] sm:$0xff] %vm103_vm2, %v112_v43  }
  0x88   :  { %189 = vst.msk [vmem:[%s290_s1 + $0x8] sm:$0xff] %vm124_vm3, %v133_v42  }
  0x8a   :  { %v154_v44 = vpop.permute.xlu1 %153   ;;  %v144_v45 = vpop.permute.xlu0 %143  }
  0x8b   :  { %190 = vst.msk [vmem:[%s290_s1 + $0x8] sm:$0xff] %vm145_vm4, %v154_v44   ;;  %146 = vst.msk [vmem:[%s290_s1] sm:$0xff] %vm145_vm4, %v144_v45  }

// kernel: discriminator_forward.3
= control target key start
LH: loop header
LB: loop body
LE: loop exit
PB: predicated region body
PF: predicated region fallthrough
CT: control target
= control target key end

     0   :  { %v1130_v0 = vmov 0.0   ;;  %vm1131_vm0 = vmmov 0   ;;  %v1132_v29 = vmov 0.0|0.0   ;;  %vm262_vm1 = vcmask 1040384   ;;  %s1367_s1 = inlined_call_operand.vmem [shape: bf16[3,128,64], index: 1, kind: input, shape index: {}]   ;;  %s1368_s0 = inlined_call_operand.vmem [shape: bf16[16,128], index: 0, kind: input, shape index: {}]   ;;  %s1369_s2 = inlined_call_operand.vmem [shape: f32[64,8], index: 2, kind: input, shape index: {}]   ;;  %s1370_s3 = inlined_call_operand.vmem [shape: f32[8,64], index: 3, kind: input, shape index: {}]   ;;  %s1371_s5 = inlined_call_operand.vmem [shape: f32[1,8], index: 5, kind: input, shape index: {}]   ;;  %s1372_s4 = inlined_call_operand.vmem [shape: f32[1,8], index: 4, kind: input, shape index: {}]   ;;  %s1373_s6 = inlined_call_operand.vmem [shape: bf16[16,64], index: 6, kind: output, shape index: {}]  }
   0x1   :  { %963 = vmatprep.subr.bf16.mxu0 %v1130_v0  ;;  %v1103_v1 = vld [vmem:[%s1367_s1] sm:$0xff]   ;;  %983 = vmatprep.subr.bf16.mxu1 %v1130_v0  ;;  %v1104_v2 = vld [vmem:[%s1367_s1 + $0x8] sm:$0xff]   ;;  %v1105_v3 = vld [vmem:[%s1367_s1 + $0x10] sm:$0xff]   ;;  %vm271_vm2 = vcmask 1046528   ;;  %v278_v54 = vlaneseq  ;;  %vm413_vm7 = vcmask 523264   ;;  %vm497_vm8 = vcmask 64512  }
   0x2   :  { %979 = vmatprep.mubr.msk.bf16.mxu0 %vm1131_vm0, %v1130_v0  ;;  %999 = vmatprep.mubr.msk.bf16.mxu1 %vm1131_vm0, %v1130_v0  ;;  %v1110_v4 = vld [vmem:[%s1367_s1 + $0x80] sm:$0xff]   ;;  %v1106_v5 = vld [vmem:[%s1367_s1 + $0x18] sm:$0xff]   ;;  %v1113_v6 = vld [vmem:[%s1367_s1 + $0x88] sm:$0xff]   ;;  %vm839_vm11 = vcmask 519168  }
   0x3   :  { %964 = vmatpush3.bf16.msra.mxu0 %v1103_v1  ;;  %984 = vmatpush3.bf16.msra.mxu1 %v1110_v4  ;;  %v1115_v7 = vld [vmem:[%s1367_s1 + $0x90] sm:$0xff]   ;;  %v1107_v8 = vld [vmem:[%s1367_s1 + $0x20] sm:$0xff]   ;;  %v1117_v9 = vld [vmem:[%s1367_s1 + $0x98] sm:$0xff]   ;;  %v279_v55 = vshrl.u32 %v278_v54, 7 }
   0x4   :  { %965 = vmatprep.subr.bf16.mxu0 %v1130_v0  ;;  %985 = vmatprep.subr.bf16.mxu1 %v1130_v0  ;;  %v1108_v10 = vld [vmem:[%s1367_s1 + $0x28] sm:$0xff]   ;;  %v1119_v11 = vld [vmem:[%s1367_s1 + $0xa0] sm:$0xff]   ;;  %v1109_v12 = vld [vmem:[%s1367_s1 + $0x30] sm:$0xff]  }
   0x5   :  { %v1121_v13 = vld [vmem:[%s1367_s1 + $0xa8] sm:$0xff]   ;;  %v1111_v14 = vld [vmem:[%s1367_s1 + $0x38] sm:$0xff]   ;;  %v1112_v15 = vld [vmem:[%s1368_s0] sm:$0xff]   ;;  %v280_v56 = vadd.s32 8, %v279_v55  ;;  %v285_v57 = vand.u32 7, %v279_v55 }
   0x6   :  { %v1123_v16 = vld [vmem:[%s1367_s1 + $0xb0] sm:$0xff]   ;;  %v1114_v17 = vld [vmem:[%s1367_s1 + $0x40] sm:$0xff]   ;;  %v1125_v18 = vld [vmem:[%s1367_s1 + $0xb8] sm:$0xff]  }
   0x7   :  { %966 = vmatpush3.bf16.msra.mxu0 %v1104_v2  ;;  %986 = vmatpush3.bf16.msra.mxu1 %v1113_v6  ;;  %v1116_v19 = vld [vmem:[%s1367_s1 + $0x48] sm:$0xff]   ;;  %v1118_v20 = vld [vmem:[%s1367_s1 + $0x50] sm:$0xff]   ;;  %v1120_v21 = vld [vmem:[%s1367_s1 + $0x58] sm:$0xff]   ;;  %v292_v58 = vand.u32 7, %v280_v56  ;;  %vm305_vm3 = vcmp.eq.s32.totalorder %v285_v57, 0  ;;  %vm398_vm4 = vcmp.eq.s32.totalorder %v285_v57, 7 }
   0x8   :  { %967 = vmatprep.subr.bf16.mxu0 %v1130_v0  ;;  %987 = vmatprep.subr.bf16.mxu1 %v1130_v0  ;;  %v1122_v22 = vld [vmem:[%s1367_s1 + $0x60] sm:$0xff]   ;;  %v1124_v23 = vld [vmem:[%s1367_s1 + $0x68] sm:$0xff]   ;;  %v1126_v24 = vld [vmem:[%s1367_s1 + $0x70] sm:$0xff]  }
   0x9   :  { %v1127_v25 = vld [vmem:[%s1367_s1 + $0x78] sm:$0xff]   ;;  %v404_v26 = vld [vmem:[%s1369_s2] sm:$0xff]  ;;  %v405_v27 = vld [vmem:[%s1369_s2 + $0x8] sm:$0xff]  ;;  %vm306_vm5 = vcmp.eq.s32.totalorder %v292_v58, 0  ;;  %vm399_vm6 = vcmp.eq.s32.totalorder %v292_v58, 7 }
   0xa   :  { %v1284_v28 = vpack.c.bf16 %v405_v27, %v404_v26  ;;  %v406_v30 = vld [vmem:[%s1369_s2 + $0x10] sm:$0xff]  ;;  %v407_v31 = vld [vmem:[%s1369_s2 + $0x18] sm:$0xff]  ;;  %v408_v33 = vld [vmem:[%s1369_s2 + $0x20] sm:$0xff] }
   0xb   :  { %968 = vmatpush3.bf16.msra.mxu0 %v1105_v3  ;;  %988 = vmatpush3.bf16.msra.mxu1 %v1115_v7  ;;  %v1295_v32 = vpack.c.bf16 %v407_v31, %v406_v30  ;;  %v409_v34 = vld [vmem:[%s1369_s2 + $0x28] sm:$0xff]  ;;  %v410_v36 = vld [vmem:[%s1369_s2 + $0x30] sm:$0xff]  ;;  %v411_v37 = vld [vmem:[%s1369_s2 + $0x38] sm:$0xff] }
   0xc   :  { %969 = vmatprep.subr.bf16.mxu0 %v1130_v0  ;;  %989 = vmatprep.subr.bf16.mxu1 %v1130_v0  ;;  %v1305_v35 = vpack.c.bf16 %v409_v34, %v408_v33  ;;  %v1315_v38 = vpack.c.bf16 %v411_v37, %v410_v36  ;;  %v1322_v39 = vld [vmem:[%s1370_s3] sm:$0xff] }
   0xf   :  { %970 = vmatpush3.bf16.msra.mxu0 %v1106_v5  ;;  %990 = vmatpush3.bf16.msra.mxu1 %v1117_v9 }
  0x10   :  { %971 = vmatprep.subr.bf16.mxu0 %v1130_v0  ;;  %991 = vmatprep.subr.bf16.mxu1 %v1130_v0 }
  0x13   :  { %972 = vmatpush3.bf16.msra.mxu0 %v1107_v8  ;;  %992 = vmatpush3.bf16.msra.mxu1 %v1119_v11 }
  0x14   :  { %973 = vmatprep.subr.bf16.mxu0 %v1130_v0  ;;  %993 = vmatprep.subr.bf16.mxu1 %v1130_v0 }
  0x17   :  { %974 = vmatpush3.bf16.msra.mxu0 %v1108_v10  ;;  %994 = vmatpush3.bf16.msra.mxu1 %v1121_v13 }
  0x18   :  { %975 = vmatprep.subr.bf16.mxu0 %v1130_v0  ;;  %995 = vmatprep.subr.bf16.mxu1 %v1130_v0 }
  0x1b   :  { %976 = vmatpush3.bf16.msra.mxu0 %v1109_v12  ;;  %996 = vmatpush3.bf16.msra.mxu1 %v1123_v16 }
  0x1c   :  { %977 = vmatprep.subr.bf16.mxu0 %v1130_v0  ;;  %997 = vmatprep.subr.bf16.mxu1 %v1130_v0 }
  0x1f   :  { %978 = vmatpush3.bf16.msra.mxu0 %v1111_v14  ;;  %998 = vmatpush3.bf16.msra.mxu1 %v1125_v18 }
  0x20   :  { %1003 = vmatprep.subr.bf16.mxu0 %v1130_v0  ;;  %1076 = vmatprep.subr.bf16.mxu1 %v1132_v29 }
  0x22   :  { %980 = vmatmul.mubr.bf16.vlgmr.msra.gmra.mrb[0].mxu0 %v1112_v15  ;;  %1000 = vmatmul.mubr.bf16.vlgmr.msra.gmra.mrb[0].mxu1 %v1112_v15 }
  0x23   :  { %1004 = vmatpush3.bf16.msra.mxu0 %v1114_v17  ;;  %1019 = vmatprep.mubr.msk.bf16.mxu0 %vm1131_vm0, %v1130_v0 }
  0x24   :  { %1005 = vmatprep.subr.bf16.mxu0 %v1130_v0  ;;  %1039 = vmatprep.mubr.msk.f32.mxu1 %vm1131_vm0, %v1130_v0 }
  0x25   :  { %1078 = vmatpush3.bf16.msra.mxu1 %v1284_v28 }
  0x26   :  { %1079 = vmatprep.subr.bf16.mxu1 %v1132_v29 }
  0x27   :  { %1006 = vmatpush3.bf16.msra.mxu0 %v1116_v19 }
  0x28   :  { %1007 = vmatprep.subr.bf16.mxu0 %v1130_v0 }
  0x29   :  { %1081 = vmatpush3.bf16.msra.mxu1 %v1295_v32 }
  0x2a   :  { %1082 = vmatprep.subr.bf16.mxu1 %v1132_v29 }
  0x2b   :  { %1008 = vmatpush3.bf16.msra.mxu0 %v1118_v20 }
  0x2c   :  { %1009 = vmatprep.subr.bf16.mxu0 %v1130_v0 }
  0x2d   :  { %1084 = vmatpush3.bf16.msra.mxu1 %v1305_v35 }
  0x2e   :  { %1085 = vmatprep.subr.bf16.mxu1 %v1132_v29 }
  0x2f   :  { %1010 = vmatpush3.bf16.msra.mxu0 %v1120_v21 }
  0x30   :  { %1011 = vmatprep.subr.bf16.mxu0 %v1130_v0 }
  0x31   :  { %1087 = vmatpush3.bf16.msra.mxu1 %v1315_v38 }
  0x32   :  { %1042 = vmatprep.subr.mxu1 %v1130_v0 }
  0x33   :  { %1012 = vmatpush3.bf16.msra.mxu0 %v1122_v22  ;;  %v573_v22 = vsub.s32 0, %v279_v55 }
  0x34   :  { %1013 = vmatprep.subr.bf16.mxu0 %v1130_v0 }
  0x37   :  { %1014 = vmatpush3.bf16.msra.mxu0 %v1124_v23 }
  0x38   :  { %1015 = vmatprep.subr.bf16.mxu0 %v1130_v0 }
  0x3b   :  { %1016 = vmatpush3.bf16.msra.mxu0 %v1126_v24 }
  0x3c   :  { %1017 = vmatprep.subr.bf16.mxu0 %v1130_v0 }
  0x3f   :  { %1018 = vmatpush3.bf16.msra.mxu0 %v1127_v25 }
  0x40   :  { %1066 = vmatprep.subr.mxu0 %v1130_v0 }
  0x42   :  { %1020 = vmatmul.mubr.bf16.vlgmr.msra.gmra.mrb[4].mxu0 %v1112_v15 }
  0x43   :  { %1068 = vmatprep.mubr.msk.f32.mxu0 %vm1131_vm0, %v1130_v0  ;;  %1067 = vmatpush3.msra.mxu0 %v1322_v39 }
  0xf5   :  { %v130_v40 = vpop.f32.mrb[0].mxu0  ;;  %v253_v47 = vpop.f32.mrb[0].mxu1 }
  0xf6   :  { %v263_v41 = vrot.slane %v130_v40, 7  ;;  %v981_v42 = vpop.f32.mrb[1].mxu0  ;;  %v272_v48 = vrot.slane %v253_v47, 1  ;;  %v1001_v49 = vpop.f32.mrb[1].mxu1  ;;  %v745_v40 = vld [vmem:[%s1371_s5] sm:$0x1] }
  0xf7   :  { %v133_v43 = vpop.f32.mrb[2].mxu0  ;;  %v256_v50 = vpop.f32.mrb[2].mxu1 }
  0xf8   :  { %v264_v44 = vrot.slane %v133_v43, 7  ;;  %v982_v45 = vpop.f32.mrb[3].mxu0  ;;  %v273_v51 = vrot.slane %v256_v50, 1  ;;  %v1002_v52 = vpop.f32.mrb[3].mxu1  ;;  %v268_v59 = vsel %vm262_vm1, 0.0, %v263_v41 }
  0xf9   :  { %v307_v60 = vsel %vm305_vm3, 0.0, %v268_v59  ;;  %v662_v45 = vld [vmem:[%s1372_s4] sm:$0x1] }
  0xfa   :  { %v265_v46 = vsel %vm262_vm1, %v263_v41, %v264_v44  ;;  %v274_v53 = vsel %vm271_vm2, %v272_v48, %v273_v51  ;;  %v277_v63 = vsel %vm271_vm2, %v273_v51, 0.0 }
  0xfb   :  { %v400_v62 = vsel %vm398_vm4, 0.0, %v274_v53  ;;  %v308_v3 = vsel %vm306_vm5, 0.0, %v265_v46  ;;  %v401_v8 = vsel %vm399_vm6, 0.0, %v277_v63 }
 0x115   :  { %v391_v61 = vpop.f32.mrb[4].mxu0 }
 0x116   :  { %v392_v1 = vadd.f32 %v391_v61, %v307_v60  ;;  %v1021_v2 = vpop.f32.mrb[5].mxu0 }
 0x117   :  { %v394_v4 = vpop.f32.mrb[6].mxu0 }
 0x118   :  { %v402_v5 = vadd.f32 %v400_v62, %v392_v1  ;;  %v395_v6 = vadd.f32 %v394_v4, %v308_v3  ;;  %v1022_v7 = vpop.f32.mrb[7].mxu0 }
 0x11a   :  { %v403_v9 = vadd.f32 %v401_v8, %v395_v6  ;;  %v414_v10 = vsel %vm413_vm7, %v402_v5, 0.0 }
 0x11c   :  { %v415_v11 = vsel %vm413_vm7, %v403_v9, 0.0 }
 0x11d   :  { %v416_v12 = vadd.f32 %v415_v11, %v414_v10 }
 0x11f   :  { %v417_v13 = vrot.slane %v416_v12, 4 }
 0x121   :  { %v418_v14 = vadd.f32 %v417_v13, %v416_v12 }
 0x123   :  { %v419_v15 = vrot.slane %v418_v14, 2 }
 0x125   :  { %v420_v16 = vadd.f32 %v419_v15, %v418_v14 }
 0x127   :  { %v421_v17 = vrot.slane %v420_v16, 1 }
 0x129   :  { %v422_v18 = vadd.f32 %v421_v17, %v420_v16 }
 0x12b   :  { %1040 = vmatmul.mubr.msk.f32.vlgmr.msra.gmra.mrb[4].mxu1 %vm413_vm7, %v422_v18 }
 0x12c   :  { %1043 = vmatpush3.msra.mxu1 %v1322_v39  ;;  %1044 = vmatprep.mubr.msk.f32.mxu1 %vm1131_vm0, %v1130_v0 }
 0x12d   :  { %1088 = vmatprep.subr.bf16.mxu1 %v1132_v29 }
 0x1fe   :  { %v492_v19 = vpop.f32.mrb[4].mxu1 }
 0x1ff   :  { %v496_v20 = vmul.f32 0.0078125, %v492_v19  ;;  %v1041_v21 = vpop.f32.mrb[5].mxu1 }
 0x201   :  { %1045 = vmatmul.mubr.msk.f32.vlgmr.msra.gmra.mrb[6].mxu1 %vm497_vm8, %v496_v20 }
 0x202   :  { %1090 = vmatpush3.bf16.msra.mxu1 %v1284_v28  ;;  %1063 = vmatprep.mubr.msk.f32.mxu1 %vm1131_vm0, %v1130_v0 }
 0x203   :  { %1091 = vmatprep.subr.bf16.mxu1 %v1132_v29 }
 0x206   :  { %1093 = vmatpush3.bf16.msra.mxu1 %v1295_v32 }
 0x207   :  { %1094 = vmatprep.subr.bf16.mxu1 %v1132_v29 }
 0x20a   :  { %1096 = vmatpush3.bf16.msra.mxu1 %v1305_v35 }
 0x20b   :  { %1097 = vmatprep.subr.bf16.mxu1 %v1132_v29 }
 0x20e   :  { %1099 = vmatpush3.bf16.msra.mxu1 %v1315_v38 }
 0x20f   :  { %1071 = vmatprep.subr.mxu1 %v1130_v0 }
 0x2d4   :  { %v567_v23 = vpop.f32.mrb[6].mxu1 }
 0x2d5   :  { %v574_v24 = vrot.slane %v567_v23, %v573_v22  ;;  %v1046_v25 = vpop.f32.mrb[7].mxu1 }
 0x2d7   :  { %v575_v26 = vsub.f32 %v402_v5, %v574_v24  ;;  %v576_v27 = vsub.f32 %v403_v9, %v574_v24 }
 0x2d9   :  { %v577_v28 = vmul.f32 %v575_v26, %v575_v26  ;;  %v578_v30 = vmul.f32 %v576_v27, %v576_v27 }
 0x2db   :  { %v579_v31 = vsel %vm413_vm7, %v577_v28, 0.0  ;;  %v580_v32 = vsel %vm413_vm7, %v578_v30, 0.0 }
 0x2dc   :  { %v581_v33 = vadd.f32 %v580_v32, %v579_v31 }
 0x2de   :  { %v582_v34 = vrot.slane %v581_v33, 4 }
 0x2e0   :  { %v583_v35 = vadd.f32 %v582_v34, %v581_v33 }
 0x2e2   :  { %v584_v29 = vrot.slane %v583_v35, 2 }
 0x2e4   :  { %v585_v36 = vadd.f32 %v584_v29, %v583_v35 }
 0x2e6   :  { %v586_v37 = vrot.slane %v585_v36, 1 }
 0x2e8   :  { %v587_v38 = vadd.f32 %v586_v37, %v585_v36 }
 0x2ea   :  { %1064 = vmatmul.mubr.msk.f32.vlgmr.msra.gmra.mrb[8].mxu1 %vm413_vm7, %v587_v38 }
 0x2eb   :  { %1072 = vmatpush3.msra.mxu1 %v1322_v39  ;;  %1073 = vmatprep.mubr.msk.f32.mxu1 %vm1131_vm0, %v1130_v0 }
 0x2ee   :  { %1074 = vmatmul.mubr.msk.f32.vlgmr.msra.gmra.mrb[10].mxu1 %vm497_vm8, %v745_v40 }
 0x3bd   :  { %v657_v41 = vpop.f32.mrb[8].mxu1 }
 0x3be   :  { %v661_v42 = vmul.f32 0.0078125, %v657_v41  ;;  %v1065_v43 = vpop.f32.mrb[9].mxu1 }
 0x3c0   :  { %v663_v44 = vadd.f32 1e-05, %v661_v42 }
 0x3c1   :  { %v815_v0 = vpop.f32.mrb[10].mxu1 }
 0x3c2   :  { %1128 = vrsqrt.f32 %v663_v44  ;;  %v1075_v47 = vpop.f32.mrb[11].mxu1  ;;  %v822_v51 = vrot.slane %v815_v0, %v573_v22 }
 0x3cc   :  { %v1129_v46 = vpop.eup %1128 }
 0x3cd   :  { %v665_v39 = vmul.f32 %v1129_v46, %v662_v45 }
 0x3cf   :  { %1069 = vmatmul.mubr.msk.f32.vlgmr.msra.gmra.mrb[8].mxu0 %vm497_vm8, %v665_v39 }
 0x4a2   :  { %v735_v48 = vpop.f32.mrb[8].mxu0 }
 0x4a3   :  { %v742_v49 = vrot.slane %v735_v48, %v573_v22  ;;  %v1070_v50 = vpop.f32.mrb[9].mxu0 }
 0x4a5   :  { %v743_v52 = vmul.f32 %v742_v49, %v575_v26  ;;  %v744_v53 = vmul.f32 %v742_v49, %v576_v27 }
 0x4a7   :  { %v823_v54 = vadd.f32 %v822_v51, %v743_v52  ;;  %v824_v55 = vadd.f32 %v822_v51, %v744_v53 }
 0x4a9   :  { %vm825_vm9 = vcmp.gt.f32.partialorder %v823_v54, 0.0  ;;  %vm826_vm10 = vcmp.gt.f32.partialorder %v824_v55, 0.0  ;;  %v827_v56 = vmul.f32 0.2, %v823_v54  ;;  %v828_v57 = vmul.f32 0.2, %v824_v55 }
 0x4ab   :  { %v829_v58 = vsel %vm825_vm9, %v823_v54, %v827_v56  ;;  %v830_v59 = vsel %vm826_vm10, %v824_v55, %v828_v57 }
 0x4ac   :  { %v910_v60 = vpack.c.bf16 %v829_v58, %v829_v58  ;;  %v911_v61 = vpack.c.bf16 %v830_v59, %v830_v59 }
 0x4ae   :  { %840 = vst.msk [vmem:[%s1373_s6] sm:$0xf] %vm839_vm11, %v910_v60  ;;  %841 = vst.msk [vmem:[%s1373_s6 + $0x4] sm:$0xf] %vm839_vm11, %v911_v61 }

// kernel: discriminator_forward.4
= control target key start
LH: loop header
LB: loop body
LE: loop exit
PB: predicated region body
PF: predicated region fallthrough
CT: control target
= control target key end

     0   :  { %v1088_v0 = vmov 0.0   ;;  %vm1089_vm0 = vmmov 0   ;;  %v1090_v29 = vmov 0.0|0.0   ;;  %v261_v50 = vlaneseq  ;;  %s1311_s1 = inlined_call_operand.vmem [shape: bf16[3,128,64], index: 1, kind: input, shape index: {}]   ;;  %s1312_s0 = inlined_call_operand.vmem [shape: bf16[8,128], index: 0, kind: input, shape index: {}]   ;;  %s1313_s2 = inlined_call_operand.vmem [shape: f32[64,16], index: 2, kind: input, shape index: {}]   ;;  %s1314_s3 = inlined_call_operand.vmem [shape: f32[16,64], index: 3, kind: input, shape index: {}]   ;;  %s1315_s5 = inlined_call_operand.vmem [shape: f32[1,16], index: 5, kind: input, shape index: {}]   ;;  %s1316_s4 = inlined_call_operand.vmem [shape: f32[1,16], index: 4, kind: input, shape index: {}]   ;;  %s1317_s6 = inlined_call_operand.vmem [shape: bf16[8,64], index: 6, kind: output, shape index: {}]  }
   0x1   :  { %907 = vmatprep.subr.bf16.mxu0 %v1088_v0  ;;  %v1062_v1 = vld [vmem:[%s1311_s1] sm:$0xff]   ;;  %927 = vmatprep.subr.bf16.mxu1 %v1088_v0  ;;  %v1063_v2 = vld [vmem:[%s1311_s1 + $0x8] sm:$0xff]   ;;  %v1064_v3 = vld [vmem:[%s1311_s1 + $0x10] sm:$0xff]   ;;  %vm259_vm1 = vcmask 1046528   ;;  %vm254_vm2 = vcmask 1040384   ;;  %vm378_vm5 = vcmask 523264  }
   0x2   :  { %923 = vmatprep.mubr.msk.bf16.mxu0 %vm1089_vm0, %v1088_v0  ;;  %943 = vmatprep.mubr.msk.bf16.mxu1 %vm1089_vm0, %v1088_v0  ;;  %v1069_v4 = vld [vmem:[%s1311_s1 + $0x80] sm:$0xff]   ;;  %v1065_v5 = vld [vmem:[%s1311_s1 + $0x18] sm:$0xff]   ;;  %v1071_v6 = vld [vmem:[%s1311_s1 + $0x88] sm:$0xff]   ;;  %v262_v51 = vshrl.u32 %v261_v50, 7  ;;  %vm460_vm6 = vcmask 130048   ;;  %vm786_vm8 = vcmask 519168  }
   0x3   :  { %908 = vmatpush3.bf16.msra.mxu0 %v1062_v1  ;;  %928 = vmatpush3.bf16.msra.mxu1 %v1069_v4  ;;  %v1073_v7 = vld [vmem:[%s1311_s1 + $0x90] sm:$0xff]   ;;  %v1066_v8 = vld [vmem:[%s1311_s1 + $0x20] sm:$0xff]   ;;  %v1075_v9 = vld [vmem:[%s1311_s1 + $0x98] sm:$0xff]  }
   0x4   :  { %909 = vmatprep.subr.bf16.mxu0 %v1088_v0  ;;  %929 = vmatprep.subr.bf16.mxu1 %v1088_v0  ;;  %v1067_v10 = vld [vmem:[%s1311_s1 + $0x28] sm:$0xff]   ;;  %v1077_v11 = vld [vmem:[%s1311_s1 + $0xa0] sm:$0xff]   ;;  %v1068_v12 = vld [vmem:[%s1311_s1 + $0x30] sm:$0xff]   ;;  %v267_v54 = vand.u32 3, %v262_v51 }
   0x5   :  { %v1079_v13 = vld [vmem:[%s1311_s1 + $0xa8] sm:$0xff]   ;;  %v1070_v14 = vld [vmem:[%s1311_s1 + $0x38] sm:$0xff]   ;;  %v1081_v15 = vld [vmem:[%s1311_s1 + $0xb0] sm:$0xff]  }
   0x6   :  { %v24_v16 = vld [vmem:[%s1312_s0] sm:$0xf]  ;;  %v1083_v18 = vld [vmem:[%s1311_s1 + $0xb8] sm:$0xff]   ;;  %v1074_v19 = vld [vmem:[%s1311_s1 + $0x48] sm:$0xff]   ;;  %vm275_vm3 = vcmp.eq.s32.totalorder %v267_v54, 0  ;;  %vm365_vm4 = vcmp.eq.s32.totalorder %v267_v54, 3 }
   0x7   :  { %910 = vmatpush3.bf16.msra.mxu0 %v1063_v2  ;;  %930 = vmatpush3.bf16.msra.mxu1 %v1071_v6  ;;  %v1072_v17 = vld [vmem:[%s1311_s1 + $0x40] sm:$0xff]   ;;  %v1076_v20 = vld [vmem:[%s1311_s1 + $0x50] sm:$0xff]   ;;  %v1078_v21 = vld [vmem:[%s1311_s1 + $0x58] sm:$0xff]  }
   0x8   :  { %911 = vmatprep.subr.bf16.mxu0 %v1088_v0  ;;  %931 = vmatprep.subr.bf16.mxu1 %v1088_v0  ;;  %v1080_v22 = vld [vmem:[%s1311_s1 + $0x60] sm:$0xff]   ;;  %v1082_v23 = vld [vmem:[%s1311_s1 + $0x68] sm:$0xff]   ;;  %v1084_v24 = vld [vmem:[%s1311_s1 + $0x70] sm:$0xff]  }
   0x9   :  { %v1085_v25 = vld [vmem:[%s1311_s1 + $0x78] sm:$0xff]   ;;  %v368_v26 = vld [vmem:[%s1313_s2] sm:$0xff]  ;;  %v369_v27 = vld [vmem:[%s1313_s2 + $0x8] sm:$0xff] }
   0xa   :  { %v1241_v28 = vpack.c.bf16 %v369_v27, %v368_v26  ;;  %v370_v30 = vld [vmem:[%s1313_s2 + $0x10] sm:$0xff]  ;;  %v371_v31 = vld [vmem:[%s1313_s2 + $0x18] sm:$0xff]  ;;  %v372_v33 = vld [vmem:[%s1313_s2 + $0x20] sm:$0xff] }
   0xb   :  { %912 = vmatpush3.bf16.msra.mxu0 %v1064_v3  ;;  %932 = vmatpush3.bf16.msra.mxu1 %v1073_v7  ;;  %v1253_v32 = vpack.c.bf16 %v371_v31, %v370_v30  ;;  %v373_v34 = vld [vmem:[%s1313_s2 + $0x28] sm:$0xff]  ;;  %v374_v36 = vld [vmem:[%s1313_s2 + $0x30] sm:$0xff]  ;;  %v375_v37 = vld [vmem:[%s1313_s2 + $0x38] sm:$0xff] }
   0xc   :  { %913 = vmatprep.subr.bf16.mxu0 %v1088_v0  ;;  %933 = vmatprep.subr.bf16.mxu1 %v1088_v0  ;;  %v1033_v35 = vpack.c.bf16 %v373_v34, %v372_v33  ;;  %v1036_v38 = vpack.c.bf16 %v375_v37, %v374_v36  ;;  %v376_v39 = vld [vmem:[%s1314_s3] sm:$0xff]  ;;  %v377_v40 = vld [vmem:[%s1314_s3 + $0x8] sm:$0xff] }
   0xd   :  { %v1277_v41 = vpack.c.bf16 %v377_v40, %v376_v39  ;;  %v621_v30 = vld [vmem:[%s1316_s4] sm:$0x1] }
   0xf   :  { %914 = vmatpush3.bf16.msra.mxu0 %v1065_v5  ;;  %934 = vmatpush3.bf16.msra.mxu1 %v1075_v9 }
  0x10   :  { %915 = vmatprep.subr.bf16.mxu0 %v1088_v0  ;;  %935 = vmatprep.subr.bf16.mxu1 %v1088_v0 }
  0x13   :  { %916 = vmatpush3.bf16.msra.mxu0 %v1066_v8  ;;  %936 = vmatpush3.bf16.msra.mxu1 %v1077_v11 }
  0x14   :  { %917 = vmatprep.subr.bf16.mxu0 %v1088_v0  ;;  %937 = vmatprep.subr.bf16.mxu1 %v1088_v0 }
  0x17   :  { %918 = vmatpush3.bf16.msra.mxu0 %v1067_v10  ;;  %938 = vmatpush3.bf16.msra.mxu1 %v1079_v13 }
  0x18   :  { %919 = vmatprep.subr.bf16.mxu0 %v1088_v0  ;;  %939 = vmatprep.subr.bf16.mxu1 %v1088_v0 }
  0x1b   :  { %920 = vmatpush3.bf16.msra.mxu0 %v1068_v12  ;;  %940 = vmatpush3.bf16.msra.mxu1 %v1081_v15  ;;  %v536_v12 = vsub.s32 0, %v262_v51 }
  0x1c   :  { %921 = vmatprep.subr.bf16.mxu0 %v1088_v0  ;;  %941 = vmatprep.subr.bf16.mxu1 %v1088_v0 }
  0x1f   :  { %922 = vmatpush3.bf16.msra.mxu0 %v1070_v14  ;;  %942 = vmatpush3.bf16.msra.mxu1 %v1083_v18 }
  0x20   :  { %947 = vmatprep.subr.bf16.mxu0 %v1088_v0  ;;  %1026 = vmatprep.subr.bf16.mxu1 %v1090_v29 }
  0x22   :  { %924 = vmatmul.mubr.bf16.vlgmr.msra.gmra.mrb[0].mxu0 %v24_v16  ;;  %944 = vmatmul.mubr.bf16.vlgmr.msra.gmra.mrb[0].mxu1 %v24_v16 }
  0x23   :  { %948 = vmatpush3.bf16.msra.mxu0 %v1072_v17  ;;  %963 = vmatprep.mubr.msk.bf16.mxu0 %vm1089_vm0, %v1088_v0 }
  0x24   :  { %949 = vmatprep.subr.bf16.mxu0 %v1088_v0  ;;  %983 = vmatprep.mubr.msk.f32.mxu1 %vm1089_vm0, %v1088_v0 }
  0x25   :  { %1028 = vmatpush3.bf16.msra.mxu1 %v1241_v28 }
  0x26   :  { %1029 = vmatprep.subr.bf16.mxu1 %v1090_v29 }
  0x27   :  { %950 = vmatpush3.bf16.msra.mxu0 %v1074_v19 }
  0x28   :  { %951 = vmatprep.subr.bf16.mxu0 %v1088_v0 }
  0x29   :  { %1031 = vmatpush3.bf16.msra.mxu1 %v1253_v32 }
  0x2a   :  { %1032 = vmatprep.subr.bf16.mxu1 %v1090_v29 }
  0x2b   :  { %952 = vmatpush3.bf16.msra.mxu0 %v1076_v20 }
  0x2c   :  { %953 = vmatprep.subr.bf16.mxu0 %v1088_v0 }
  0x2d   :  { %1034 = vmatpush3.bf16.msra.mxu1 %v1033_v35 }
  0x2e   :  { %1035 = vmatprep.subr.bf16.mxu1 %v1090_v29 }
  0x2f   :  { %954 = vmatpush3.bf16.msra.mxu0 %v1078_v21 }
  0x30   :  { %955 = vmatprep.subr.bf16.mxu0 %v1088_v0 }
  0x31   :  { %1037 = vmatpush3.bf16.msra.mxu1 %v1036_v38 }
  0x32   :  { %1038 = vmatprep.subr.bf16.mxu1 %v1090_v29 }
  0x33   :  { %956 = vmatpush3.bf16.msra.mxu0 %v1080_v22 }
  0x34   :  { %957 = vmatprep.subr.bf16.mxu0 %v1088_v0 }
  0x37   :  { %958 = vmatpush3.bf16.msra.mxu0 %v1082_v23 }
  0x38   :  { %959 = vmatprep.subr.bf16.mxu0 %v1088_v0 }
  0x3b   :  { %960 = vmatpush3.bf16.msra.mxu0 %v1084_v24 }
  0x3c   :  { %961 = vmatprep.subr.bf16.mxu0 %v1088_v0 }
  0x3f   :  { %962 = vmatpush3.bf16.msra.mxu0 %v1085_v25  ;;  %v703_v25 = vld [vmem:[%s1315_s5] sm:$0x1] }
  0x40   :  { %1053 = vmatprep.subr.bf16.mxu0 %v1090_v29 }
  0x42   :  { %964 = vmatmul.mubr.bf16.vlgmr.msra.gmra.mrb[4].mxu0 %v24_v16 }
  0x43   :  { %1016 = vmatprep.mubr.msk.f32.mxu0 %vm1089_vm0, %v1088_v0  ;;  %1055 = vmatpush3.bf16.msra.mxu0 %v1277_v41 }
  0xf5   :  { %v123_v42 = vpop.f32.mrb[0].mxu0  ;;  %v245_v46 = vpop.f32.mrb[0].mxu1 }
  0xf6   :  { %v925_v43 = vpop.f32.mrb[1].mxu0  ;;  %v945_v47 = vpop.f32.mrb[1].mxu1  ;;  %v252_v52 = vrot.slane %v123_v42, 7  ;;  %v257_v53 = vrot.slane %v245_v46, 1 }
  0xf7   :  { %v126_v44 = vpop.f32.mrb[2].mxu0  ;;  %v248_v48 = vpop.f32.mrb[2].mxu1 }
  0xf8   :  { %v926_v45 = vpop.f32.mrb[3].mxu0  ;;  %v946_v49 = vpop.f32.mrb[3].mxu1  ;;  %v260_v55 = vsel %vm259_vm1, %v257_v53, 0.0  ;;  %v255_v56 = vsel %vm254_vm2, 0.0, %v252_v52 }
  0xf9   :  { %v276_v57 = vsel %vm275_vm3, 0.0, %v255_v56  ;;  %v366_v59 = vsel %vm365_vm4, 0.0, %v260_v55 }
 0x115   :  { %v359_v58 = vpop.f32.mrb[4].mxu0 }
 0x116   :  { %v360_v60 = vadd.f32 %v359_v58, %v276_v57  ;;  %v965_v61 = vpop.f32.mrb[5].mxu0 }
 0x117   :  { %v362_v62 = vpop.f32.mrb[6].mxu0 }
 0x118   :  { %v367_v63 = vadd.f32 %v366_v59, %v360_v60  ;;  %v966_v1 = vpop.f32.mrb[7].mxu0 }
 0x11a   :  { %v379_v2 = vsel %vm378_vm5, %v367_v63, 0.0 }
 0x11b   :  { %v380_v3 = vrot.slane %v379_v2, 4 }
 0x11d   :  { %v381_v4 = vadd.f32 %v380_v3, %v379_v2 }
 0x11f   :  { %v382_v5 = vrot.slane %v381_v4, 2 }
 0x121   :  { %v383_v6 = vadd.f32 %v382_v5, %v381_v4 }
 0x123   :  { %v384_v7 = vrot.slane %v383_v6, 1 }
 0x125   :  { %v385_v8 = vadd.f32 %v384_v7, %v383_v6 }
 0x127   :  { %984 = vmatmul.mubr.msk.f32.vlgmr.msra.gmra.mrb[4].mxu1 %vm378_vm5, %v385_v8 }
 0x128   :  { %1040 = vmatpush3.bf16.msra.mxu1 %v1277_v41  ;;  %990 = vmatprep.mubr.msk.f32.mxu1 %vm1089_vm0, %v1088_v0 }
 0x129   :  { %1041 = vmatprep.subr.bf16.mxu1 %v1090_v29 }
 0x1fa   :  { %v455_v9 = vpop.f32.mrb[4].mxu1 }
 0x1fb   :  { %v459_v10 = vmul.f32 0.03125, %v455_v9  ;;  %v985_v11 = vpop.f32.mrb[5].mxu1 }
 0x1fd   :  { %991 = vmatmul.mubr.msk.f32.vlgmr.msra.gmra.mrb[6].mxu1 %vm460_vm6, %v459_v10 }
 0x1fe   :  { %1043 = vmatpush3.bf16.msra.mxu1 %v1241_v28  ;;  %1009 = vmatprep.mubr.msk.f32.mxu1 %vm1089_vm0, %v1088_v0 }
 0x1ff   :  { %1044 = vmatprep.subr.bf16.mxu1 %v1090_v29 }
 0x202   :  { %1046 = vmatpush3.bf16.msra.mxu1 %v1253_v32 }
 0x203   :  { %1047 = vmatprep.subr.bf16.mxu1 %v1090_v29 }
 0x206   :  { %1049 = vmatpush3.bf16.msra.mxu1 %v1033_v35 }
 0x207   :  { %1050 = vmatprep.subr.bf16.mxu1 %v1090_v29 }
 0x20a   :  { %1052 = vmatpush3.bf16.msra.mxu1 %v1036_v38 }
 0x20b   :  { %1056 = vmatprep.subr.bf16.mxu1 %v1090_v29 }
 0x2d0   :  { %v530_v13 = vpop.f32.mrb[6].mxu1 }
 0x2d1   :  { %v537_v14 = vrot.slane %v530_v13, %v536_v12  ;;  %v992_v15 = vpop.f32.mrb[7].mxu1 }
 0x2d3   :  { %v538_v16 = vsub.f32 %v367_v63, %v537_v14 }
 0x2d5   :  { %v539_v17 = vmul.f32 %v538_v16, %v538_v16 }
 0x2d7   :  { %v540_v18 = vsel %vm378_vm5, %v539_v17, 0.0 }
 0x2d8   :  { %v541_v19 = vrot.slane %v540_v18, 4 }
 0x2da   :  { %v542_v20 = vadd.f32 %v541_v19, %v540_v18 }
 0x2dc   :  { %v543_v21 = vrot.slane %v542_v20, 2 }
 0x2de   :  { %v544_v22 = vadd.f32 %v543_v21, %v542_v20 }
 0x2e0   :  { %v545_v23 = vrot.slane %v544_v22, 1 }
 0x2e2   :  { %v546_v24 = vadd.f32 %v545_v23, %v544_v22 }
 0x2e4   :  { %1010 = vmatmul.mubr.msk.f32.vlgmr.msra.gmra.mrb[8].mxu1 %vm378_vm5, %v546_v24 }
 0x2e5   :  { %1058 = vmatpush3.bf16.msra.mxu1 %v1277_v41  ;;  %1023 = vmatprep.mubr.msk.f32.mxu1 %vm1089_vm0, %v1088_v0 }
 0x2e8   :  { %1024 = vmatmul.mubr.msk.f32.vlgmr.msra.gmra.mrb[10].mxu1 %vm460_vm6, %v703_v25 }
 0x3b7   :  { %v616_v26 = vpop.f32.mrb[8].mxu1 }
 0x3b8   :  { %v620_v27 = vmul.f32 0.03125, %v616_v26  ;;  %v1011_v28 = vpop.f32.mrb[9].mxu1 }
 0x3ba   :  { %v622_v29 = vadd.f32 1e-05, %v620_v27 }
 0x3bb   :  { %v773_v0 = vpop.f32.mrb[10].mxu1 }
 0x3bc   :  { %1086 = vrsqrt.f32 %v622_v29  ;;  %v1025_v33 = vpop.f32.mrb[11].mxu1  ;;  %v780_v37 = vrot.slane %v773_v0, %v536_v12 }
 0x3c6   :  { %v1087_v31 = vpop.eup %1086 }
 0x3c7   :  { %v624_v32 = vmul.f32 %v1087_v31, %v621_v30 }
 0x3c9   :  { %1017 = vmatmul.mubr.msk.f32.vlgmr.msra.gmra.mrb[8].mxu0 %vm460_vm6, %v624_v32 }
 0x49c   :  { %v694_v34 = vpop.f32.mrb[8].mxu0 }
 0x49d   :  { %v701_v35 = vrot.slane %v694_v34, %v536_v12  ;;  %v1018_v36 = vpop.f32.mrb[9].mxu0 }
 0x49f   :  { %v702_v38 = vmul.f32 %v701_v35, %v538_v16 }
 0x4a1   :  { %v781_v39 = vadd.f32 %v780_v37, %v702_v38 }
 0x4a3   :  { %vm782_vm7 = vcmp.gt.f32.partialorder %v781_v39, 0.0  ;;  %v783_v40 = vmul.f32 0.2, %v781_v39 }
 0x4a5   :  { %v784_v41 = vsel %vm782_vm7, %v781_v39, %v783_v40 }
 0x4a6   :  { %v785_v42 = vpack.c.bf16 %v784_v41, %v784_v41 }
 0x4a8   :  { %787 = vst.msk [vmem:[%s1317_s6] sm:$0xf] %vm786_vm8, %v785_v42 }

// kernel: discriminator_forward.5
= control target key start
LH: loop header
LB: loop body
LE: loop exit
PB: predicated region body
PF: predicated region fallthrough
CT: control target
= control target key end

     0   :  { %v589_v1 = vmov 0.0   ;;  %vm590_vm0 = vmmov 0   ;;  %s732_s0 = inlined_call_operand.vmem [shape: bf16[4,128], index: 0, kind: input, shape index: {}]   ;;  %s733_s1 = inlined_call_operand.vmem [shape: bf16[3,128,2], index: 1, kind: input, shape index: {}]   ;;  %s734_s2 = inlined_call_operand.vmem [shape: f32[1,2], index: 2, kind: input, shape index: {}]   ;;  %s735_s3 = inlined_call_operand.hbm [shape: f32[4,2], index: 3, kind: output, shape index: {}]  }
   0x1   :  { %v537_v0 = vld [vmem:[%s733_s1] sm:$0xff]   ;;  %474 = vmatprep.subr.bf16.mxu0 %v589_v1  ;;  %494 = vmatprep.subr.bf16.mxu1 %v589_v1  ;;  %v538_v2 = vld [vmem:[%s733_s1 + $0x8] sm:$0xff]   ;;  %v539_v3 = vld [vmem:[%s733_s1 + $0x10] sm:$0xff]  }
   0x2   :  { %475 = vmatpush3.bf16.msra.mxu0 %v537_v0  ;;  %490 = vmatprep.mubr.msk.bf16.mxu0 %vm590_vm0, %v589_v1  ;;  %v544_v4 = vld [vmem:[%s733_s1 + $0x80] sm:$0xff]   ;;  %v540_v5 = vld [vmem:[%s733_s1 + $0x18] sm:$0xff]   ;;  %v546_v6 = vld [vmem:[%s733_s1 + $0x88] sm:$0xff]  }
   0x3   :  { %476 = vmatprep.subr.bf16.mxu0 %v589_v1  ;;  %510 = vmatprep.mubr.msk.bf16.mxu1 %vm590_vm0, %v589_v1  ;;  %v548_v7 = vld [vmem:[%s733_s1 + $0x90] sm:$0xff]   ;;  %v541_v8 = vld [vmem:[%s733_s1 + $0x20] sm:$0xff]   ;;  %v550_v9 = vld [vmem:[%s733_s1 + $0x98] sm:$0xff]  }
   0x4   :  { %495 = vmatpush3.bf16.msra.mxu1 %v544_v4  ;;  %v542_v10 = vld [vmem:[%s733_s1 + $0x28] sm:$0xff]   ;;  %v552_v11 = vld [vmem:[%s733_s1 + $0xa0] sm:$0xff]   ;;  %v543_v12 = vld [vmem:[%s733_s1 + $0x30] sm:$0xff]  }
   0x5   :  { %496 = vmatprep.subr.bf16.mxu1 %v589_v1 }
   0x6   :  { %477 = vmatpush3.bf16.msra.mxu0 %v538_v2 }
   0x7   :  { %478 = vmatprep.subr.bf16.mxu0 %v589_v1 }
   0x8   :  { %497 = vmatpush3.bf16.msra.mxu1 %v546_v6 }
   0x9   :  { %498 = vmatprep.subr.bf16.mxu1 %v589_v1 }
   0xa   :  { %479 = vmatpush3.bf16.msra.mxu0 %v539_v3 }
   0xb   :  { %480 = vmatprep.subr.bf16.mxu0 %v589_v1 }
   0xc   :  { %499 = vmatpush3.bf16.msra.mxu1 %v548_v7 }
   0xd   :  { %500 = vmatprep.subr.bf16.mxu1 %v589_v1 }
   0xe   :  { %481 = vmatpush3.bf16.msra.mxu0 %v540_v5 }
   0xf   :  { %482 = vmatprep.subr.bf16.mxu0 %v589_v1 }
  0x10   :  { %501 = vmatpush3.bf16.msra.mxu1 %v550_v9 }
  0x11   :  { %502 = vmatprep.subr.bf16.mxu1 %v589_v1 }
  0x12   :  { %483 = vmatpush3.bf16.msra.mxu0 %v541_v8 }
  0x13   :  { %484 = vmatprep.subr.bf16.mxu0 %v589_v1 }
  0x16   :  { %485 = vmatpush3.bf16.msra.mxu0 %v542_v10 }
  0x17   :  { %486 = vmatprep.subr.bf16.mxu0 %v589_v1 }
  0x18   :  { %8 = vsyncpa [#allocation3], 0  ;;  %503 = vmatpush3.bf16.msra.mxu1 %v552_v11  ;;  %v554_v13 = vld [vmem:[%s733_s1 + $0xa8] sm:$0xff]   ;;  %v545_v14 = vld [vmem:[%s733_s1 + $0x38] sm:$0xff]   ;;  %v253_v34 = vlaneseq  ;;  %vm251_vm1 = vcmask 1042432   ;;  %vm246_vm2 = vcmask 1040384  }
  0x19   :  { %504 = vmatprep.subr.bf16.mxu1 %v589_v1  ;;  %v556_v15 = vld [vmem:[%s733_s1 + $0xb0] sm:$0xff]   ;;  %v16_v16 = vld [vmem:[%s732_s0] sm:$0x3]  ;;  %v558_v18 = vld [vmem:[%s733_s1 + $0xb8] sm:$0xff]   ;;  %s591_s8 = smov [#allocation2]   ;;  %vm374_vm5 = vcmask 11264  }
  0x1a   :  { %487 = vmatpush3.bf16.msra.mxu0 %v543_v12  ;;  %v547_v17 = vld [vmem:[%s733_s1 + $0x40] sm:$0xff]   ;;  %v549_v19 = vld [vmem:[%s733_s1 + $0x48] sm:$0xff]   ;;  %v551_v20 = vld [vmem:[%s733_s1 + $0x50] sm:$0xff]   ;;  %v254_v35 = vshrl.u32 %v253_v34, 7  ;;  %s382_s9 = sshll.u32 %s591_s8, 4  ;;  %s383_s9 = int_to_ptr.vmem [resolvable:$true] %s382_s9 }
  0x1b   :  { %488 = vmatprep.subr.bf16.mxu0 %v589_v1  ;;  %v553_v21 = vld [vmem:[%s733_s1 + $0x58] sm:$0xff]   ;;  %v555_v22 = vld [vmem:[%s733_s1 + $0x60] sm:$0xff]   ;;  %v557_v23 = vld [vmem:[%s733_s1 + $0x68] sm:$0xff]   ;;  %s565_s10 = scalar_lea.vmem %s383_s9, 64  ;;  %p570_p1 = scmp.lt.s32.totalorder %s383_s9, %s383_s9 }
  0x1c   :  { %505 = vmatpush3.bf16.msra.mxu1 %v554_v13  ;;  %v559_v24 = vld [vmem:[%s733_s1 + $0x70] sm:$0xff]   ;;  %v560_v25 = vld [vmem:[%s733_s1 + $0x78] sm:$0xff]   ;;  %v259_v38 = vand.u32 1, %v254_v35  ;;  %v446_v46 = vld [vmem:[%s734_s2] ss:$0 sm:$0xff]  ;;  %p566_p0 = scmp.ne.s32.totalorder %s383_s9, %s565_s10  ;;  %p571_p2 = scmp.lt.s32.totalorder %s565_s10, %s565_s10 }
  0x1d   :  { %506 = vmatprep.subr.bf16.mxu1 %v589_v1 }
  0x1e   :  { %489 = vmatpush3.bf16.msra.mxu0 %v545_v14  ;;  %vm267_vm3 = vcmp.eq.s32.totalorder %v259_v38, 0  ;;  %vm357_vm4 = vcmp.eq.s32.totalorder %v259_v38, 1  ;;  %p572_p3 = por %p571_p2, %p570_p1 }
  0x1f   :  { %514 = vmatprep.subr.bf16.mxu0 %v589_v1 }
  0x20   :  { %507 = vmatpush3.bf16.msra.mxu1 %v556_v15  ;;  %p573_p4 = pnand %p572_p3, %p566_p0 }
  0x21   :  { %491 = vmatmul.mubr.bf16.vlgmr.msra.gmra.mrb[0].mxu0 %v16_v16  ;;  %508 = vmatprep.subr.bf16.mxu1 %v589_v1 }
  0x22   :  { %515 = vmatpush3.bf16.msra.mxu0 %v547_v17  ;;  %530 = vmatprep.mubr.msk.bf16.mxu0 %vm590_vm0, %v589_v1 }
  0x23   :  { %516 = vmatprep.subr.bf16.mxu0 %v589_v1 }
  0x24   :  { %509 = vmatpush3.bf16.msra.mxu1 %v558_v18 }
  0x26   :  { %517 = vmatpush3.bf16.msra.mxu0 %v549_v19 }
  0x27   :  { %518 = vmatprep.subr.bf16.mxu0 %v589_v1  ;;  %511 = vmatmul.mubr.bf16.vlgmr.msra.gmra.mrb[0].mxu1 %v16_v16 }
  0x2a   :  { %519 = vmatpush3.bf16.msra.mxu0 %v551_v20 }
  0x2b   :  { %520 = vmatprep.subr.bf16.mxu0 %v589_v1 }
  0x2e   :  { %521 = vmatpush3.bf16.msra.mxu0 %v553_v21 }
  0x2f   :  { %522 = vmatprep.subr.bf16.mxu0 %v589_v1 }
  0x32   :  { %523 = vmatpush3.bf16.msra.mxu0 %v555_v22 }
  0x33   :  { %524 = vmatprep.subr.bf16.mxu0 %v589_v1 }
  0x36   :  { %525 = vmatpush3.bf16.msra.mxu0 %v557_v23 }
  0x37   :  { %526 = vmatprep.subr.bf16.mxu0 %v589_v1 }
  0x3a   :  { %527 = vmatpush3.bf16.msra.mxu0 %v559_v24 }
  0x3b   :  { %528 = vmatprep.subr.bf16.mxu0 %v589_v1 }
  0x3e   :  { %529 = vmatpush3.bf16.msra.mxu0 %v560_v25 }
  0x41   :  { %531 = vmatmul.mubr.bf16.vlgmr.msra.gmra.mrb[4].mxu0 %v16_v16 }
  0xf4   :  { %v115_v26 = vpop.f32.mrb[0].mxu0 }
  0xf5   :  { %v492_v27 = vpop.f32.mrb[1].mxu0  ;;  %v244_v36 = vrot.slane %v115_v26, 7 }
  0xf6   :  { %v118_v28 = vpop.f32.mrb[2].mxu0 }
  0xf7   :  { %v493_v29 = vpop.f32.mrb[3].mxu0  ;;  %v247_v40 = vsel %vm246_vm2, 0.0, %v244_v36 }
  0xf8   :  { %v268_v41 = vsel %vm267_vm3, 0.0, %v247_v40 }
  0xfa   :  { %v237_v30 = vpop.f32.mrb[0].mxu1 }
  0xfb   :  { %v512_v31 = vpop.f32.mrb[1].mxu1  ;;  %v249_v37 = vrot.slane %v237_v30, 1 }
  0xfc   :  { %v240_v32 = vpop.f32.mrb[2].mxu1 }
  0xfd   :  { %v513_v33 = vpop.f32.mrb[3].mxu1  ;;  %v252_v39 = vsel %vm251_vm1, %v249_v37, 0.0 }
  0xfe   :  { %v358_v43 = vsel %vm357_vm4, 0.0, %v252_v39 }
 0x114   :  { %v351_v42 = vpop.f32.mrb[4].mxu0 }
 0x115   :  { %v352_v44 = vadd.f32 %v351_v42, %v268_v41  ;;  %v532_v45 = vpop.f32.mrb[5].mxu0 }
 0x116   :  { %v354_v47 = vpop.f32.mrb[6].mxu0 }
 0x117   :  { %v359_v48 = vadd.f32 %v358_v43, %v352_v44  ;;  %v533_v49 = vpop.f32.mrb[7].mxu0 }
 0x119   :  { %v367_v50 = vadd.f32 %v446_v46, %v359_v48 }
 0x11b   :  { %v368_v51 = vsub.f32 0.0, %v367_v50 }
 0x11d   :  { %v369_v52 = vmul.f32 1.442695, %v368_v51 }
 0x11f   :  { %561 = vpow2.f32 %v369_v52 }
 0x129   :  { %v562_v53 = vpop.eup %561 }
 0x12a   :  { %v371_v54 = vadd.f32 1.0, %v562_v53 }
 0x12c   :  { %563 = vrcp.f32 %v371_v54 }
 0x136   :  { %v564_v55 = vpop.eup %563 }
 0x137   :  { %375 = vst.msk [vmem:[#allocation2] sm:$0xf] %vm374_vm5, %v564_v55 }
 0x138   :  { %576 = shalt.err (!%p573_p4)
}
 0x139   :  { %s577_s12 = scalar_lea.hbm %s735_s3, 64 }
 0x13a   :  { %p578_p5 = scmp.ne.s32.totalorder %s735_s3, %s577_s12  ;;  %p581_p6 = scmp.lt.u32.totalorder %s577_s12, %s735_s3 }
 0x13c   :  { %p583_p7 = pnand %p581_p6, %p578_p5 }
 0x13e   :  { %586 = shalt.err (!%p583_p7)
}
 0x13f   :  { %385 = dma.vmem_to_hbm [thread:$0]  %s383_s9, 64, %s735_s3, [#allocation3]  }
 0x140   :  { %587 = dma.done.wait [#allocation3], 64  }
 0x141   :  { %588 = vsyncadd [#allocation3], 4294967232 }
 0x142   :  { %389 = vsyncpa [#allocation3], 1 }

</bundles_post_ra>
